<compile_context>
chip_gen: v7x
topology: tpu7x:2x2x1
jax: 0.10.0
libtpu: 0.0.40
codegen_flags: <defaults>
</compile_context>

<pallas_src>
import jax
import jax.numpy as jnp
from jax.experimental import pallas as pl
from jax.experimental.pallas import tpu as pltpu

KERNEL_SIZE = 7
PAD = 3  # padding = 3 for kernel_size 7 (matches the PyTorch module)


def _round_up(x, m):
    return ((x + m - 1) // m) * m


def _choose_channel_tile(C, H, W, itemsize, budget_bytes=6 * 1024 * 1024):
    """Largest divisor of C whose (Ct, H, W) block, double-buffered, fits the budget.

    Budget is kept conservative so the pipeline fits the default scoped VMEM on
    every generation (16 MiB on v5e, 32 MiB on v6e/v7x) without special flags.
    """
    max_ct = max(1, budget_bytes // max(1, 2 * H * W * itemsize))
    ct = 1
    for d in range(1, C + 1):
        if C % d == 0 and d <= max_ct:
            ct = d
    return ct


def spatial_attention(x, conv_weight):
    """x: (B, C, H, W) any float dtype; conv_weight: (1, 2, 7, 7) -> (B, 1, H, W) in x.dtype."""
    B, C, H, W = x.shape
    out_dtype = x.dtype

    # Padded-plane geometry: pad H by 3 on both sides; pad W on the *right* by
    # >= 6 zero columns and round the lane dim up to a multiple of 128 so the
    # XLU rolls and band loads stay lane aligned.
    Hp = _round_up(H + 2 * PAD, 8)
    Wp = _round_up(W + 2 * PAD, 128)

    ct = _choose_channel_tile(C, H, W, jnp.dtype(x.dtype).itemsize)
    n_c = C // ct
    inv_c = 1.0 / C
    KK = KERNEL_SIZE * KERNEL_SIZE

    # Flat conv weights as SMEM scalars. Input-channel 0 = avg plane, 1 = max plane.
    w_flat = conv_weight.astype(jnp.float32).reshape(-1)  # (2*7*7,)

    def kernel(w_ref, x_ref, o_ref,
               sum_ref, max_ref, avgp_ref, maxp_ref, ra_ref, rm_ref):
        c = pl.program_id(1)

        @pl.when(c == 0)
        def _init():
            sum_ref[...] = jnp.zeros_like(sum_ref)
            max_ref[...] = jnp.full(max_ref.shape, -jnp.inf, dtype=jnp.float32)

        # Streamed channel reduction: native-dtype block, f32 accumulators.
        xb = x_ref[0].astype(jnp.float32)                       # (ct, H, W)
        sum_ref[...] = sum_ref[...] + jnp.sum(xb, axis=0)
        max_ref[...] = jnp.maximum(max_ref[...], jnp.max(xb, axis=0))

        @pl.when(c == n_c - 1)
        def _conv_and_store():
            # Zero-padded planes: rows [PAD, PAD+H) x cols [0, W) hold the data;
            # everything else (top/bottom rows, right columns) is zero.
            avgp_ref[...] = jnp.zeros_like(avgp_ref)
            maxp_ref[...] = jnp.zeros_like(maxp_ref)
            avgp_ref[PAD:PAD + H, 0:W] = sum_ref[...]           # raw sum; 1/C folded into weights
            maxp_ref[PAD:PAD + H, 0:W] = max_ref[...]

            acc = jnp.zeros((H, Wp), jnp.float32)
            for kx in range(KERNEL_SIZE):
                # Column offset d = kx - PAD realised as an XLU lane roll by -d
                # (mod Wp); wrapped-in columns are the zero pad, so no mask.
                shift = (PAD - kx) % Wp
                if shift == 0:
                    a_src, m_src = avgp_ref, maxp_ref
                else:
                    ra_ref[...] = pltpu.roll(avgp_ref[...], shift, axis=1)
                    rm_ref[...] = pltpu.roll(maxp_ref[...], shift, axis=1)
                    a_src, m_src = ra_ref, rm_ref
                for ky in range(KERNEL_SIZE):
                    w_avg = w_ref[ky * KERNEL_SIZE + kx] * inv_c
                    w_max = w_ref[KK + ky * KERNEL_SIZE + kx]
                    acc = acc + w_avg * a_src[ky:ky + H, :]     # sublane-offset band loads
                    acc = acc + w_max * m_src[ky:ky + H, :]

            o_ref[0, 0] = jax.nn.sigmoid(acc[:, 0:W]).astype(o_ref.dtype)

    return pl.pallas_call(
        kernel,
        out_shape=jax.ShapeDtypeStruct((B, 1, H, W), out_dtype),
        grid=(B, n_c),
        in_specs=[
            pl.BlockSpec(memory_space=pltpu.MemorySpace.SMEM),       # conv weights (scalars)
            pl.BlockSpec((1, ct, H, W), lambda b, c: (b, c, 0, 0)),  # x, native dtype
        ],
        out_specs=pl.BlockSpec((1, 1, H, W), lambda b, c: (b, 0, 0, 0)),
        scratch_shapes=[
            pltpu.VMEM((H, W), jnp.float32),    # running channel sum
            pltpu.VMEM((H, W), jnp.float32),    # running channel max
            pltpu.VMEM((Hp, Wp), jnp.float32),  # zero-padded avg(sum) plane
            pltpu.VMEM((Hp, Wp), jnp.float32),  # zero-padded max plane
            pltpu.VMEM((Hp, Wp), jnp.float32),  # lane-rolled avg plane
            pltpu.VMEM((Hp, Wp), jnp.float32),  # lane-rolled max plane
        ],
        compiler_params=pltpu.CompilerParams(
            dimension_semantics=("parallel", "arbitrary")),
    )(w_flat, x)


def _reference(x, conv_weight):
    """Pure-JAX reference matching the PyTorch forward."""
    avg = jnp.mean(x, axis=1, keepdims=True)
    mx = jnp.max(x, axis=1, keepdims=True)
    cat = jnp.concatenate([avg, mx], axis=1)
    y = jax.lax.conv_general_dilated(
        cat, conv_weight, window_strides=(1, 1),
        padding=((PAD, PAD), (PAD, PAD)),
        dimension_numbers=("NCHW", "OIHW", "NCHW"),
    )
    return jax.nn.sigmoid(y)


if __name__ == "__main__":
    key = jax.random.PRNGKey(0)
    kx_key, kw_key = jax.random.split(key)

    # Small shapes consistent with the module's forward.
    B, C, H, W = 2, 4, 16, 16
    x = jax.random.normal(kx_key, (B, C, H, W), dtype=jnp.float32)

    # Deterministic synthetic conv weight: (out=1, in=2, 7, 7), no bias.
    conv_weight = 0.1 * jax.random.normal(
        kw_key, (1, 2, KERNEL_SIZE, KERNEL_SIZE), dtype=jnp.float32)

    out = spatial_attention(x, conv_weight)
    out = jax.block_until_ready(out)

    ref = _reference(x, conv_weight)
    assert out.shape == (B, 1, H, W)
    assert jnp.allclose(out, ref, atol=1e-5, rtol=1e-5), (
        f"max abs err {float(jnp.max(jnp.abs(out - ref)))}")

    print("KERNEL_OK")
</pallas_src>

<mosaic_0001>
module attributes {stable_mosaic.version = 11 : i64} {
  func.func @kernel(%arg0: i32, %arg1: i32, %arg2: memref<98xf32, #tpu.memory_space<smem>>, %arg3: memref<1x4x16x16xf32, #tpu.memory_space<vmem>>, %arg4: memref<1x1x16x16xf32, #tpu.memory_space<vmem>>, %arg5: memref<16x16xf32, #tpu.memory_space<vmem>>, %arg6: memref<16x16xf32, #tpu.memory_space<vmem>>, %arg7: memref<24x128xf32, #tpu.memory_space<vmem>>, %arg8: memref<24x128xf32, #tpu.memory_space<vmem>>, %arg9: memref<24x128xf32, #tpu.memory_space<vmem>>, %arg10: memref<24x128xf32, #tpu.memory_space<vmem>>) attributes {dimension_semantics = [#tpu.dimension_semantics<parallel>, #tpu.dimension_semantics<arbitrary>], iteration_bounds = array<i64: 2, 1>, scalar_prefetch = 0 : i64, scratch_operands = 6 : i64, tpu.core_type = #tpu.core_type<tc>, window_params = [{transform_indices = @transform_0, window_bounds = array<i64: 98>}, {transform_indices = @transform_1, window_bounds = array<i64: 1, 4, 16, 16>}, {transform_indices = @transform_2, window_bounds = array<i64: 1, 1, 16, 16>}]} {
    %c0_i32 = arith.constant 0 : i32
    %0 = arith.cmpi eq, %arg1, %c0_i32 : i32
    %1 = arith.extui %0 : i1 to i32
    %c0_i32_0 = arith.constant 0 : i32
    %2 = arith.cmpi ne, %1, %c0_i32_0 : i32
    scf.if %2 {
      %cst_15 = arith.constant 0.000000e+00 : f32
      %16 = vector.broadcast %cst_15 : f32 to vector<16x16xf32>
      %c0_16 = arith.constant 0 : index
      %c0_17 = arith.constant 0 : index
      %17 = vector.load %arg5[%c0_16, %c0_17] : memref<16x16xf32, #tpu.memory_space<vmem>>, vector<16x16xf32>
      tpu.vector_store %arg5[%c0_16, %c0_17], %16 {strides = array<i32>} : memref<16x16xf32, #tpu.memory_space<vmem>>, vector<16x16xf32>,
      %cst_18 = arith.constant 0xFF800000 : f32
      %18 = vector.broadcast %cst_18 : f32 to vector<16x16xf32>
      %c0_19 = arith.constant 0 : index
      %c0_20 = arith.constant 0 : index
      %19 = vector.load %arg6[%c0_19, %c0_20] : memref<16x16xf32, #tpu.memory_space<vmem>>, vector<16x16xf32>
      tpu.vector_store %arg6[%c0_19, %c0_20], %18 {strides = array<i32>} : memref<16x16xf32, #tpu.memory_space<vmem>>, vector<16x16xf32>,
    } else {
    }
    %c0 = arith.constant 0 : index
    %c0_1 = arith.constant 0 : index
    %c0_2 = arith.constant 0 : index
    %c0_3 = arith.constant 0 : index
    %3 = vector.load %arg3[%c0, %c0_1, %c0_2, %c0_3] : memref<1x4x16x16xf32, #tpu.memory_space<vmem>>, vector<1x4x16x16xf32>
    %4 = vector.shape_cast %3 : vector<1x4x16x16xf32> to vector<4x16x16xf32>
    %c0_4 = arith.constant 0 : index
    %c0_5 = arith.constant 0 : index
    %5 = vector.load %arg5[%c0_4, %c0_5] : memref<16x16xf32, #tpu.memory_space<vmem>>, vector<16x16xf32>
    %cst = arith.constant dense<0.000000e+00> : vector<16x16xf32>
    %6 = vector.multi_reduction <add>, %4, %cst [0] : vector<4x16x16xf32> to vector<16x16xf32>
    %7 = arith.addf %5, %6 : vector<16x16xf32>
    %c0_6 = arith.constant 0 : index
    %c0_7 = arith.constant 0 : index
    %8 = vector.load %arg5[%c0_6, %c0_7] : memref<16x16xf32, #tpu.memory_space<vmem>>, vector<16x16xf32>
    tpu.vector_store %arg5[%c0_6, %c0_7], %7 {strides = array<i32>} : memref<16x16xf32, #tpu.memory_space<vmem>>, vector<16x16xf32>,
    %c0_8 = arith.constant 0 : index
    %c0_9 = arith.constant 0 : index
    %9 = vector.load %arg6[%c0_8, %c0_9] : memref<16x16xf32, #tpu.memory_space<vmem>>, vector<16x16xf32>
    %cst_10 = arith.constant dense<0xFF800000> : vector<16x16xf32>
    %10 = vector.multi_reduction <maximumf>, %4, %cst_10 [0] : vector<4x16x16xf32> to vector<16x16xf32>
    %11 = arith.maximumf %9, %10 : vector<16x16xf32>
    %c0_11 = arith.constant 0 : index
    %c0_12 = arith.constant 0 : index
    %12 = vector.load %arg6[%c0_11, %c0_12] : memref<16x16xf32, #tpu.memory_space<vmem>>, vector<16x16xf32>
    tpu.vector_store %arg6[%c0_11, %c0_12], %11 {strides = array<i32>} : memref<16x16xf32, #tpu.memory_space<vmem>>, vector<16x16xf32>,
    %c0_i32_13 = arith.constant 0 : i32
    %13 = arith.cmpi eq, %arg1, %c0_i32_13 : i32
    %14 = arith.extui %13 : i1 to i32
    %c0_i32_14 = arith.constant 0 : i32
    %15 = arith.cmpi ne, %14, %c0_i32_14 : i32
    scf.if %15 {
      %cst_15 = arith.constant 0.000000e+00 : f32
      %16 = vector.broadcast %cst_15 : f32 to vector<24x128xf32>
      %c0_16 = arith.constant 0 : index
      %c0_17 = arith.constant 0 : index
      %17 = vector.load %arg7[%c0_16, %c0_17] : memref<24x128xf32, #tpu.memory_space<vmem>>, vector<24x128xf32>
      tpu.vector_store %arg7[%c0_16, %c0_17], %16 {strides = array<i32>} : memref<24x128xf32, #tpu.memory_space<vmem>>, vector<24x128xf32>,
      %cst_18 = arith.constant 0.000000e+00 : f32
      %18 = vector.broadcast %cst_18 : f32 to vector<24x128xf32>
      %c0_19 = arith.constant 0 : index
      %c0_20 = arith.constant 0 : index
      %19 = vector.load %arg8[%c0_19, %c0_20] : memref<24x128xf32, #tpu.memory_space<vmem>>, vector<24x128xf32>
      tpu.vector_store %arg8[%c0_19, %c0_20], %18 {strides = array<i32>} : memref<24x128xf32, #tpu.memory_space<vmem>>, vector<24x128xf32>,
      %c0_21 = arith.constant 0 : index
      %c0_22 = arith.constant 0 : index
      %20 = vector.load %arg5[%c0_21, %c0_22] : memref<16x16xf32, #tpu.memory_space<vmem>>, vector<16x16xf32>
      %c3 = arith.constant 3 : index
      %c0_23 = arith.constant 0 : index
      %21 = vector.load %arg7[%c3, %c0_23] : memref<24x128xf32, #tpu.memory_space<vmem>>, vector<16x16xf32>
      tpu.vector_store %arg7[%c3, %c0_23], %20 {strides = array<i32>} : memref<24x128xf32, #tpu.memory_space<vmem>>, vector<16x16xf32>,
      %c0_24 = arith.constant 0 : index
      %c0_25 = arith.constant 0 : index
      %22 = vector.load %arg6[%c0_24, %c0_25] : memref<16x16xf32, #tpu.memory_space<vmem>>, vector<16x16xf32>
      %c3_26 = arith.constant 3 : index
      %c0_27 = arith.constant 0 : index
      %23 = vector.load %arg8[%c3_26, %c0_27] : memref<24x128xf32, #tpu.memory_space<vmem>>, vector<16x16xf32>
      tpu.vector_store %arg8[%c3_26, %c0_27], %22 {strides = array<i32>} : memref<24x128xf32, #tpu.memory_space<vmem>>, vector<16x16xf32>,
      %cst_28 = arith.constant 0.000000e+00 : f32
      %24 = vector.broadcast %cst_28 : f32 to vector<16x128xf32>
      %c0_29 = arith.constant 0 : index
      %c0_30 = arith.constant 0 : index
      %25 = vector.load %arg7[%c0_29, %c0_30] : memref<24x128xf32, #tpu.memory_space<vmem>>, vector<24x128xf32>
      %c3_i32 = arith.constant 3 : i32
      %26 = tpu.dynamic_rotate %25 by %c3_i32 dim 1 : vector<24x128xf32>, i32 -> vector<24x128xf32>
      %c0_31 = arith.constant 0 : index
      %c0_32 = arith.constant 0 : index
      %27 = vector.load %arg9[%c0_31, %c0_32] : memref<24x128xf32, #tpu.memory_space<vmem>>, vector<24x128xf32>
      tpu.vector_store %arg9[%c0_31, %c0_32], %26 {strides = array<i32>} : memref<24x128xf32, #tpu.memory_space<vmem>>, vector<24x128xf32>,
      %c0_33 = arith.constant 0 : index
      %c0_34 = arith.constant 0 : index
      %28 = vector.load %arg8[%c0_33, %c0_34] : memref<24x128xf32, #tpu.memory_space<vmem>>, vector<24x128xf32>
      %c3_i32_35 = arith.constant 3 : i32
      %29 = tpu.dynamic_rotate %28 by %c3_i32_35 dim 1 : vector<24x128xf32>, i32 -> vector<24x128xf32>
      %c0_36 = arith.constant 0 : index
      %c0_37 = arith.constant 0 : index
      %30 = vector.load %arg10[%c0_36, %c0_37] : memref<24x128xf32, #tpu.memory_space<vmem>>, vector<24x128xf32>
      tpu.vector_store %arg10[%c0_36, %c0_37], %29 {strides = array<i32>} : memref<24x128xf32, #tpu.memory_space<vmem>>, vector<24x128xf32>,
      %c0_38 = arith.constant 0 : index
      %31 = memref.load %arg2[%c0_38] : memref<98xf32, #tpu.memory_space<smem>>
      %cst_39 = arith.constant 2.500000e-01 : f32
      %32 = arith.mulf %31, %cst_39 : f32
      %c49 = arith.constant 49 : index
      %33 = memref.load %arg2[%c49] : memref<98xf32, #tpu.memory_space<smem>>
      %c0_40 = arith.constant 0 : index
      %c0_41 = arith.constant 0 : index
      %34 = vector.load %arg9[%c0_40, %c0_41] : memref<24x128xf32, #tpu.memory_space<vmem>>, vector<16x128xf32>
      %35 = vector.broadcast %32 : f32 to vector<16x128xf32>
      %36 = arith.mulf %35, %34 : vector<16x128xf32>
      %37 = arith.addf %24, %36 : vector<16x128xf32>
      %c0_42 = arith.constant 0 : index
      %c0_43 = arith.constant 0 : index
      %38 = vector.load %arg10[%c0_42, %c0_43] : memref<24x128xf32, #tpu.memory_space<vmem>>, vector<16x128xf32>
      %39 = vector.broadcast %33 : f32 to vector<16x128xf32>
      %40 = arith.mulf %39, %38 : vector<16x128xf32>
      %41 = arith.addf %37, %40 : vector<16x128xf32>
      %c7 = arith.constant 7 : index
      %42 = memref.load %arg2[%c7] : memref<98xf32, #tpu.memory_space<smem>>
      %cst_44 = arith.constant 2.500000e-01 : f32
      %43 = arith.mulf %42, %cst_44 : f32
      %c56 = arith.constant 56 : index
      %44 = memref.load %arg2[%c56] : memref<98xf32, #tpu.memory_space<smem>>
      %c1 = arith.constant 1 : index
      %c0_45 = arith.constant 0 : index
      %45 = vector.load %arg9[%c1, %c0_45] : memref<24x128xf32, #tpu.memory_space<vmem>>, vector<16x128xf32>
      %46 = vector.broadcast %43 : f32 to vector<16x128xf32>
      %47 = arith.mulf %46, %45 : vector<16x128xf32>
      %48 = arith.addf %41, %47 : vector<16x128xf32>
      %c1_46 = arith.constant 1 : index
      %c0_47 = arith.constant 0 : index
      %49 = vector.load %arg10[%c1_46, %c0_47] : memref<24x128xf32, #tpu.memory_space<vmem>>, vector<16x128xf32>
      %50 = vector.broadcast %44 : f32 to vector<16x128xf32>
      %51 = arith.mulf %50, %49 : vector<16x128xf32>
      %52 = arith.addf %48, %51 : vector<16x128xf32>
      %c14 = arith.constant 14 : index
      %53 = memref.load %arg2[%c14] : memref<98xf32, #tpu.memory_space<smem>>
      %cst_48 = arith.constant 2.500000e-01 : f32
      %54 = arith.mulf %53, %cst_48 : f32
      %c63 = arith.constant 63 : index
      %55 = memref.load %arg2[%c63] : memref<98xf32, #tpu.memory_space<smem>>
      %c2 = arith.constant 2 : index
      %c0_49 = arith.constant 0 : index
      %56 = vector.load %arg9[%c2, %c0_49] : memref<24x128xf32, #tpu.memory_space<vmem>>, vector<16x128xf32>
      %57 = vector.broadcast %54 : f32 to vector<16x128xf32>
      %58 = arith.mulf %57, %56 : vector<16x128xf32>
      %59 = arith.addf %52, %58 : vector<16x128xf32>
      %c2_50 = arith.constant 2 : index
      %c0_51 = arith.constant 0 : index
      %60 = vector.load %arg10[%c2_50, %c0_51] : memref<24x128xf32, #tpu.memory_space<vmem>>, vector<16x128xf32>
      %61 = vector.broadcast %55 : f32 to vector<16x128xf32>
      %62 = arith.mulf %61, %60 : vector<16x128xf32>
      %63 = arith.addf %59, %62 : vector<16x128xf32>
      %c21 = arith.constant 21 : index
      %64 = memref.load %arg2[%c21] : memref<98xf32, #tpu.memory_space<smem>>
      %cst_52 = arith.constant 2.500000e-01 : f32
      %65 = arith.mulf %64, %cst_52 : f32
      %c70 = arith.constant 70 : index
      %66 = memref.load %arg2[%c70] : memref<98xf32, #tpu.memory_space<smem>>
      %c3_53 = arith.constant 3 : index
      %c0_54 = arith.constant 0 : index
      %67 = vector.load %arg9[%c3_53, %c0_54] : memref<24x128xf32, #tpu.memory_space<vmem>>, vector<16x128xf32>
      %68 = vector.broadcast %65 : f32 to vector<16x128xf32>
      %69 = arith.mulf %68, %67 : vector<16x128xf32>
      %70 = arith.addf %63, %69 : vector<16x128xf32>
      %c3_55 = arith.constant 3 : index
      %c0_56 = arith.constant 0 : index
      %71 = vector.load %arg10[%c3_55, %c0_56] : memref<24x128xf32, #tpu.memory_space<vmem>>, vector<16x128xf32>
      %72 = vector.broadcast %66 : f32 to vector<16x128xf32>
      %73 = arith.mulf %72, %71 : vector<16x128xf32>
      %74 = arith.addf %70, %73 : vector<16x128xf32>
      %c28 = arith.constant 28 : index
      %75 = memref.load %arg2[%c28] : memref<98xf32, #tpu.memory_space<smem>>
      %cst_57 = arith.constant 2.500000e-01 : f32
      %76 = arith.mulf %75, %cst_57 : f32
      %c77 = arith.constant 77 : index
      %77 = memref.load %arg2[%c77] : memref<98xf32, #tpu.memory_space<smem>>
      %c4 = arith.constant 4 : index
      %c0_58 = arith.constant 0 : index
      %78 = vector.load %arg9[%c4, %c0_58] : memref<24x128xf32, #tpu.memory_space<vmem>>, vector<16x128xf32>
      %79 = vector.broadcast %76 : f32 to vector<16x128xf32>
      %80 = arith.mulf %79, %78 : vector<16x128xf32>
      %81 = arith.addf %74, %80 : vector<16x128xf32>
      %c4_59 = arith.constant 4 : index
      %c0_60 = arith.constant 0 : index
      %82 = vector.load %arg10[%c4_59, %c0_60] : memref<24x128xf32, #tpu.memory_space<vmem>>, vector<16x128xf32>
      %83 = vector.broadcast %77 : f32 to vector<16x128xf32>
      %84 = arith.mulf %83, %82 : vector<16x128xf32>
      %85 = arith.addf %81, %84 : vector<16x128xf32>
      %c35 = arith.constant 35 : index
      %86 = memref.load %arg2[%c35] : memref<98xf32, #tpu.memory_space<smem>>
      %cst_61 = arith.constant 2.500000e-01 : f32
      %87 = arith.mulf %86, %cst_61 : f32
      %c84 = arith.constant 84 : index
      %88 = memref.load %arg2[%c84] : memref<98xf32, #tpu.memory_space<smem>>
      %c5 = arith.constant 5 : index
      %c0_62 = arith.constant 0 : index
      %89 = vector.load %arg9[%c5, %c0_62] : memref<24x128xf32, #tpu.memory_space<vmem>>, vector<16x128xf32>
      %90 = vector.broadcast %87 : f32 to vector<16x128xf32>
      %91 = arith.mulf %90, %89 : vector<16x128xf32>
      %92 = arith.addf %85, %91 : vector<16x128xf32>
      %c5_63 = arith.constant 5 : index
      %c0_64 = arith.constant 0 : index
      %93 = vector.load %arg10[%c5_63, %c0_64] : memref<24x128xf32, #tpu.memory_space<vmem>>, vector<16x128xf32>
      %94 = vector.broadcast %88 : f32 to vector<16x128xf32>
      %95 = arith.mulf %94, %93 : vector<16x128xf32>
      %96 = arith.addf %92, %95 : vector<16x128xf32>
      %c42 = arith.constant 42 : index
      %97 = memref.load %arg2[%c42] : memref<98xf32, #tpu.memory_space<smem>>
      %cst_65 = arith.constant 2.500000e-01 : f32
      %98 = arith.mulf %97, %cst_65 : f32
      %c91 = arith.constant 91 : index
      %99 = memref.load %arg2[%c91] : memref<98xf32, #tpu.memory_space<smem>>
      %c6 = arith.constant 6 : index
      %c0_66 = arith.constant 0 : index
      %100 = vector.load %arg9[%c6, %c0_66] : memref<24x128xf32, #tpu.memory_space<vmem>>, vector<16x128xf32>
      %101 = vector.broadcast %98 : f32 to vector<16x128xf32>
      %102 = arith.mulf %101, %100 : vector<16x128xf32>
      %103 = arith.addf %96, %102 : vector<16x128xf32>
      %c6_67 = arith.constant 6 : index
      %c0_68 = arith.constant 0 : index
      %104 = vector.load %arg10[%c6_67, %c0_68] : memref<24x128xf32, #tpu.memory_space<vmem>>, vector<16x128xf32>
      %105 = vector.broadcast %99 : f32 to vector<16x128xf32>
      %106 = arith.mulf %105, %104 : vector<16x128xf32>
      %107 = arith.addf %103, %106 : vector<16x128xf32>
      %c0_69 = arith.constant 0 : index
      %c0_70 = arith.constant 0 : index
      %108 = vector.load %arg7[%c0_69, %c0_70] : memref<24x128xf32, #tpu.memory_space<vmem>>, vector<24x128xf32>
      %c2_i32 = arith.constant 2 : i32
      %109 = tpu.dynamic_rotate %108 by %c2_i32 dim 1 : vector<24x128xf32>, i32 -> vector<24x128xf32>
      %c0_71 = arith.constant 0 : index
      %c0_72 = arith.constant 0 : index
      %110 = vector.load %arg9[%c0_71, %c0_72] : memref<24x128xf32, #tpu.memory_space<vmem>>, vector<24x128xf32>
      tpu.vector_store %arg9[%c0_71, %c0_72], %109 {strides = array<i32>} : memref<24x128xf32, #tpu.memory_space<vmem>>, vector<24x128xf32>,
      %c0_73 = arith.constant 0 : index
      %c0_74 = arith.constant 0 : index
      %111 = vector.load %arg8[%c0_73, %c0_74] : memref<24x128xf32, #tpu.memory_space<vmem>>, vector<24x128xf32>
      %c2_i32_75 = arith.constant 2 : i32
      %112 = tpu.dynamic_rotate %111 by %c2_i32_75 dim 1 : vector<24x128xf32>, i32 -> vector<24x128xf32>
      %c0_76 = arith.constant 0 : index
      %c0_77 = arith.constant 0 : index
      %113 = vector.load %arg10[%c0_76, %c0_77] : memref<24x128xf32, #tpu.memory_space<vmem>>, vector<24x128xf32>
      tpu.vector_store %arg10[%c0_76, %c0_77], %112 {strides = array<i32>} : memref<24x128xf32, #tpu.memory_space<vmem>>, vector<24x128xf32>,
      %c1_78 = arith.constant 1 : index
      %114 = memref.load %arg2[%c1_78] : memref<98xf32, #tpu.memory_space<smem>>
      %cst_79 = arith.constant 2.500000e-01 : f32
      %115 = arith.mulf %114, %cst_79 : f32
      %c50 = arith.constant 50 : index
      %116 = memref.load %arg2[%c50] : memref<98xf32, #tpu.memory_space<smem>>
      %c0_80 = arith.constant 0 : index
      %c0_81 = arith.constant 0 : index
      %117 = vector.load %arg9[%c0_80, %c0_81] : memref<24x128xf32, #tpu.memory_space<vmem>>, vector<16x128xf32>
      %118 = vector.broadcast %115 : f32 to vector<16x128xf32>
      %119 = arith.mulf %118, %117 : vector<16x128xf32>
      %120 = arith.addf %107, %119 : vector<16x128xf32>
      %c0_82 = arith.constant 0 : index
      %c0_83 = arith.constant 0 : index
      %121 = vector.load %arg10[%c0_82, %c0_83] : memref<24x128xf32, #tpu.memory_space<vmem>>, vector<16x128xf32>
      %122 = vector.broadcast %116 : f32 to vector<16x128xf32>
      %123 = arith.mulf %122, %121 : vector<16x128xf32>
      %124 = arith.addf %120, %123 : vector<16x128xf32>
      %c8 = arith.constant 8 : index
      %125 = memref.load %arg2[%c8] : memref<98xf32, #tpu.memory_space<smem>>
      %cst_84 = arith.constant 2.500000e-01 : f32
      %126 = arith.mulf %125, %cst_84 : f32
      %c57 = arith.constant 57 : index
      %127 = memref.load %arg2[%c57] : memref<98xf32, #tpu.memory_space<smem>>
      %c1_85 = arith.constant 1 : index
      %c0_86 = arith.constant 0 : index
      %128 = vector.load %arg9[%c1_85, %c0_86] : memref<24x128xf32, #tpu.memory_space<vmem>>, vector<16x128xf32>
      %129 = vector.broadcast %126 : f32 to vector<16x128xf32>
      %130 = arith.mulf %129, %128 : vector<16x128xf32>
      %131 = arith.addf %124, %130 : vector<16x128xf32>
      %c1_87 = arith.constant 1 : index
      %c0_88 = arith.constant 0 : index
      %132 = vector.load %arg10[%c1_87, %c0_88] : memref<24x128xf32, #tpu.memory_space<vmem>>, vector<16x128xf32>
      %133 = vector.broadcast %127 : f32 to vector<16x128xf32>
      %134 = arith.mulf %133, %132 : vector<16x128xf32>
      %135 = arith.addf %131, %134 : vector<16x128xf32>
      %c15 = arith.constant 15 : index
      %136 = memref.load %arg2[%c15] : memref<98xf32, #tpu.memory_space<smem>>
      %cst_89 = arith.constant 2.500000e-01 : f32
      %137 = arith.mulf %136, %cst_89 : f32
      %c64 = arith.constant 64 : index
      %138 = memref.load %arg2[%c64] : memref<98xf32, #tpu.memory_space<smem>>
      %c2_90 = arith.constant 2 : index
      %c0_91 = arith.constant 0 : index
      %139 = vector.load %arg9[%c2_90, %c0_91] : memref<24x128xf32, #tpu.memory_space<vmem>>, vector<16x128xf32>
      %140 = vector.broadcast %137 : f32 to vector<16x128xf32>
      %141 = arith.mulf %140, %139 : vector<16x128xf32>
      %142 = arith.addf %135, %141 : vector<16x128xf32>
      %c2_92 = arith.constant 2 : index
      %c0_93 = arith.constant 0 : index
      %143 = vector.load %arg10[%c2_92, %c0_93] : memref<24x128xf32, #tpu.memory_space<vmem>>, vector<16x128xf32>
      %144 = vector.broadcast %138 : f32 to vector<16x128xf32>
      %145 = arith.mulf %144, %143 : vector<16x128xf32>
      %146 = arith.addf %142, %145 : vector<16x128xf32>
      %c22 = arith.constant 22 : index
      %147 = memref.load %arg2[%c22] : memref<98xf32, #tpu.memory_space<smem>>
      %cst_94 = arith.constant 2.500000e-01 : f32
      %148 = arith.mulf %147, %cst_94 : f32
      %c71 = arith.constant 71 : index
      %149 = memref.load %arg2[%c71] : memref<98xf32, #tpu.memory_space<smem>>
      %c3_95 = arith.constant 3 : index
      %c0_96 = arith.constant 0 : index
      %150 = vector.load %arg9[%c3_95, %c0_96] : memref<24x128xf32, #tpu.memory_space<vmem>>, vector<16x128xf32>
      %151 = vector.broadcast %148 : f32 to vector<16x128xf32>
      %152 = arith.mulf %151, %150 : vector<16x128xf32>
      %153 = arith.addf %146, %152 : vector<16x128xf32>
      %c3_97 = arith.constant 3 : index
      %c0_98 = arith.constant 0 : index
      %154 = vector.load %arg10[%c3_97, %c0_98] : memref<24x128xf32, #tpu.memory_space<vmem>>, vector<16x128xf32>
      %155 = vector.broadcast %149 : f32 to vector<16x128xf32>
      %156 = arith.mulf %155, %154 : vector<16x128xf32>
      %157 = arith.addf %153, %156 : vector<16x128xf32>
      %c29 = arith.constant 29 : index
      %158 = memref.load %arg2[%c29] : memref<98xf32, #tpu.memory_space<smem>>
      %cst_99 = arith.constant 2.500000e-01 : f32
      %159 = arith.mulf %158, %cst_99 : f32
      %c78 = arith.constant 78 : index
      %160 = memref.load %arg2[%c78] : memref<98xf32, #tpu.memory_space<smem>>
      %c4_100 = arith.constant 4 : index
      %c0_101 = arith.constant 0 : index
      %161 = vector.load %arg9[%c4_100, %c0_101] : memref<24x128xf32, #tpu.memory_space<vmem>>, vector<16x128xf32>
      %162 = vector.broadcast %159 : f32 to vector<16x128xf32>
      %163 = arith.mulf %162, %161 : vector<16x128xf32>
      %164 = arith.addf %157, %163 : vector<16x128xf32>
      %c4_102 = arith.constant 4 : index
      %c0_103 = arith.constant 0 : index
      %165 = vector.load %arg10[%c4_102, %c0_103] : memref<24x128xf32, #tpu.memory_space<vmem>>, vector<16x128xf32>
      %166 = vector.broadcast %160 : f32 to vector<16x128xf32>
      %167 = arith.mulf %166, %165 : vector<16x128xf32>
      %168 = arith.addf %164, %167 : vector<16x128xf32>
      %c36 = arith.constant 36 : index
      %169 = memref.load %arg2[%c36] : memref<98xf32, #tpu.memory_space<smem>>
      %cst_104 = arith.constant 2.500000e-01 : f32
      %170 = arith.mulf %169, %cst_104 : f32
      %c85 = arith.constant 85 : index
      %171 = memref.load %arg2[%c85] : memref<98xf32, #tpu.memory_space<smem>>
      %c5_105 = arith.constant 5 : index
      %c0_106 = arith.constant 0 : index
      %172 = vector.load %arg9[%c5_105, %c0_106] : memref<24x128xf32, #tpu.memory_space<vmem>>, vector<16x128xf32>
      %173 = vector.broadcast %170 : f32 to vector<16x128xf32>
      %174 = arith.mulf %173, %172 : vector<16x128xf32>
      %175 = arith.addf %168, %174 : vector<16x128xf32>
      %c5_107 = arith.constant 5 : index
      %c0_108 = arith.constant 0 : index
      %176 = vector.load %arg10[%c5_107, %c0_108] : memref<24x128xf32, #tpu.memory_space<vmem>>, vector<16x128xf32>
      %177 = vector.broadcast %171 : f32 to vector<16x128xf32>
      %178 = arith.mulf %177, %176 : vector<16x128xf32>
      %179 = arith.addf %175, %178 : vector<16x128xf32>
      %c43 = arith.constant 43 : index
      %180 = memref.load %arg2[%c43] : memref<98xf32, #tpu.memory_space<smem>>
      %cst_109 = arith.constant 2.500000e-01 : f32
      %181 = arith.mulf %180, %cst_109 : f32
      %c92 = arith.constant 92 : index
      %182 = memref.load %arg2[%c92] : memref<98xf32, #tpu.memory_space<smem>>
      %c6_110 = arith.constant 6 : index
      %c0_111 = arith.constant 0 : index
      %183 = vector.load %arg9[%c6_110, %c0_111] : memref<24x128xf32, #tpu.memory_space<vmem>>, vector<16x128xf32>
      %184 = vector.broadcast %181 : f32 to vector<16x128xf32>
      %185 = arith.mulf %184, %183 : vector<16x128xf32>
      %186 = arith.addf %179, %185 : vector<16x128xf32>
      %c6_112 = arith.constant 6 : index
      %c0_113 = arith.constant 0 : index
      %187 = vector.load %arg10[%c6_112, %c0_113] : memref<24x128xf32, #tpu.memory_space<vmem>>, vector<16x128xf32>
      %188 = vector.broadcast %182 : f32 to vector<16x128xf32>
      %189 = arith.mulf %188, %187 : vector<16x128xf32>
      %190 = arith.addf %186, %189 : vector<16x128xf32>
      %c0_114 = arith.constant 0 : index
      %c0_115 = arith.constant 0 : index
      %191 = vector.load %arg7[%c0_114, %c0_115] : memref<24x128xf32, #tpu.memory_space<vmem>>, vector<24x128xf32>
      %c1_i32 = arith.constant 1 : i32
      %192 = tpu.dynamic_rotate %191 by %c1_i32 dim 1 : vector<24x128xf32>, i32 -> vector<24x128xf32>
      %c0_116 = arith.constant 0 : index
      %c0_117 = arith.constant 0 : index
      %193 = vector.load %arg9[%c0_116, %c0_117] : memref<24x128xf32, #tpu.memory_space<vmem>>, vector<24x128xf32>
      tpu.vector_store %arg9[%c0_116, %c0_117], %192 {strides = array<i32>} : memref<24x128xf32, #tpu.memory_space<vmem>>, vector<24x128xf32>,
      %c0_118 = arith.constant 0 : index
      %c0_119 = arith.constant 0 : index
      %194 = vector.load %arg8[%c0_118, %c0_119] : memref<24x128xf32, #tpu.memory_space<vmem>>, vector<24x128xf32>
      %c1_i32_120 = arith.constant 1 : i32
      %195 = tpu.dynamic_rotate %194 by %c1_i32_120 dim 1 : vector<24x128xf32>, i32 -> vector<24x128xf32>
      %c0_121 = arith.constant 0 : index
      %c0_122 = arith.constant 0 : index
      %196 = vector.load %arg10[%c0_121, %c0_122] : memref<24x128xf32, #tpu.memory_space<vmem>>, vector<24x128xf32>
      tpu.vector_store %arg10[%c0_121, %c0_122], %195 {strides = array<i32>} : memref<24x128xf32, #tpu.memory_space<vmem>>, vector<24x128xf32>,
      %c2_123 = arith.constant 2 : index
      %197 = memref.load %arg2[%c2_123] : memref<98xf32, #tpu.memory_space<smem>>
      %cst_124 = arith.constant 2.500000e-01 : f32
      %198 = arith.mulf %197, %cst_124 : f32
      %c51 = arith.constant 51 : index
      %199 = memref.load %arg2[%c51] : memref<98xf32, #tpu.memory_space<smem>>
      %c0_125 = arith.constant 0 : index
      %c0_126 = arith.constant 0 : index
      %200 = vector.load %arg9[%c0_125, %c0_126] : memref<24x128xf32, #tpu.memory_space<vmem>>, vector<16x128xf32>
      %201 = vector.broadcast %198 : f32 to vector<16x128xf32>
      %202 = arith.mulf %201, %200 : vector<16x128xf32>
      %203 = arith.addf %190, %202 : vector<16x128xf32>
      %c0_127 = arith.constant 0 : index
      %c0_128 = arith.constant 0 : index
      %204 = vector.load %arg10[%c0_127, %c0_128] : memref<24x128xf32, #tpu.memory_space<vmem>>, vector<16x128xf32>
      %205 = vector.broadcast %199 : f32 to vector<16x128xf32>
      %206 = arith.mulf %205, %204 : vector<16x128xf32>
      %207 = arith.addf %203, %206 : vector<16x128xf32>
      %c9 = arith.constant 9 : index
      %208 = memref.load %arg2[%c9] : memref<98xf32, #tpu.memory_space<smem>>
      %cst_129 = arith.constant 2.500000e-01 : f32
      %209 = arith.mulf %208, %cst_129 : f32
      %c58 = arith.constant 58 : index
      %210 = memref.load %arg2[%c58] : memref<98xf32, #tpu.memory_space<smem>>
      %c1_130 = arith.constant 1 : index
      %c0_131 = arith.constant 0 : index
      %211 = vector.load %arg9[%c1_130, %c0_131] : memref<24x128xf32, #tpu.memory_space<vmem>>, vector<16x128xf32>
      %212 = vector.broadcast %209 : f32 to vector<16x128xf32>
      %213 = arith.mulf %212, %211 : vector<16x128xf32>
      %214 = arith.addf %207, %213 : vector<16x128xf32>
      %c1_132 = arith.constant 1 : index
      %c0_133 = arith.constant 0 : index
      %215 = vector.load %arg10[%c1_132, %c0_133] : memref<24x128xf32, #tpu.memory_space<vmem>>, vector<16x128xf32>
      %216 = vector.broadcast %210 : f32 to vector<16x128xf32>
      %217 = arith.mulf %216, %215 : vector<16x128xf32>
      %218 = arith.addf %214, %217 : vector<16x128xf32>
      %c16 = arith.constant 16 : index
      %219 = memref.load %arg2[%c16] : memref<98xf32, #tpu.memory_space<smem>>
      %cst_134 = arith.constant 2.500000e-01 : f32
      %220 = arith.mulf %219, %cst_134 : f32
      %c65 = arith.constant 65 : index
      %221 = memref.load %arg2[%c65] : memref<98xf32, #tpu.memory_space<smem>>
      %c2_135 = arith.constant 2 : index
      %c0_136 = arith.constant 0 : index
      %222 = vector.load %arg9[%c2_135, %c0_136] : memref<24x128xf32, #tpu.memory_space<vmem>>, vector<16x128xf32>
      %223 = vector.broadcast %220 : f32 to vector<16x128xf32>
      %224 = arith.mulf %223, %222 : vector<16x128xf32>
      %225 = arith.addf %218, %224 : vector<16x128xf32>
      %c2_137 = arith.constant 2 : index
      %c0_138 = arith.constant 0 : index
      %226 = vector.load %arg10[%c2_137, %c0_138] : memref<24x128xf32, #tpu.memory_space<vmem>>, vector<16x128xf32>
      %227 = vector.broadcast %221 : f32 to vector<16x128xf32>
      %228 = arith.mulf %227, %226 : vector<16x128xf32>
      %229 = arith.addf %225, %228 : vector<16x128xf32>
      %c23 = arith.constant 23 : index
      %230 = memref.load %arg2[%c23] : memref<98xf32, #tpu.memory_space<smem>>
      %cst_139 = arith.constant 2.500000e-01 : f32
      %231 = arith.mulf %230, %cst_139 : f32
      %c72 = arith.constant 72 : index
      %232 = memref.load %arg2[%c72] : memref<98xf32, #tpu.memory_space<smem>>
      %c3_140 = arith.constant 3 : index
      %c0_141 = arith.constant 0 : index
      %233 = vector.load %arg9[%c3_140, %c0_141] : memref<24x128xf32, #tpu.memory_space<vmem>>, vector<16x128xf32>
      %234 = vector.broadcast %231 : f32 to vector<16x128xf32>
      %235 = arith.mulf %234, %233 : vector<16x128xf32>
      %236 = arith.addf %229, %235 : vector<16x128xf32>
      %c3_142 = arith.constant 3 : index
      %c0_143 = arith.constant 0 : index
      %237 = vector.load %arg10[%c3_142, %c0_143] : memref<24x128xf32, #tpu.memory_space<vmem>>, vector<16x128xf32>
      %238 = vector.broadcast %232 : f32 to vector<16x128xf32>
      %239 = arith.mulf %238, %237 : vector<16x128xf32>
      %240 = arith.addf %236, %239 : vector<16x128xf32>
      %c30 = arith.constant 30 : index
      %241 = memref.load %arg2[%c30] : memref<98xf32, #tpu.memory_space<smem>>
      %cst_144 = arith.constant 2.500000e-01 : f32
      %242 = arith.mulf %241, %cst_144 : f32
      %c79 = arith.constant 79 : index
      %243 = memref.load %arg2[%c79] : memref<98xf32, #tpu.memory_space<smem>>
      %c4_145 = arith.constant 4 : index
      %c0_146 = arith.constant 0 : index
      %244 = vector.load %arg9[%c4_145, %c0_146] : memref<24x128xf32, #tpu.memory_space<vmem>>, vector<16x128xf32>
      %245 = vector.broadcast %242 : f32 to vector<16x128xf32>
      %246 = arith.mulf %245, %244 : vector<16x128xf32>
      %247 = arith.addf %240, %246 : vector<16x128xf32>
      %c4_147 = arith.constant 4 : index
      %c0_148 = arith.constant 0 : index
      %248 = vector.load %arg10[%c4_147, %c0_148] : memref<24x128xf32, #tpu.memory_space<vmem>>, vector<16x128xf32>
      %249 = vector.broadcast %243 : f32 to vector<16x128xf32>
      %250 = arith.mulf %249, %248 : vector<16x128xf32>
      %251 = arith.addf %247, %250 : vector<16x128xf32>
      %c37 = arith.constant 37 : index
      %252 = memref.load %arg2[%c37] : memref<98xf32, #tpu.memory_space<smem>>
      %cst_149 = arith.constant 2.500000e-01 : f32
      %253 = arith.mulf %252, %cst_149 : f32
      %c86 = arith.constant 86 : index
      %254 = memref.load %arg2[%c86] : memref<98xf32, #tpu.memory_space<smem>>
      %c5_150 = arith.constant 5 : index
      %c0_151 = arith.constant 0 : index
      %255 = vector.load %arg9[%c5_150, %c0_151] : memref<24x128xf32, #tpu.memory_space<vmem>>, vector<16x128xf32>
      %256 = vector.broadcast %253 : f32 to vector<16x128xf32>
      %257 = arith.mulf %256, %255 : vector<16x128xf32>
      %258 = arith.addf %251, %257 : vector<16x128xf32>
      %c5_152 = arith.constant 5 : index
      %c0_153 = arith.constant 0 : index
      %259 = vector.load %arg10[%c5_152, %c0_153] : memref<24x128xf32, #tpu.memory_space<vmem>>, vector<16x128xf32>
      %260 = vector.broadcast %254 : f32 to vector<16x128xf32>
      %261 = arith.mulf %260, %259 : vector<16x128xf32>
      %262 = arith.addf %258, %261 : vector<16x128xf32>
      %c44 = arith.constant 44 : index
      %263 = memref.load %arg2[%c44] : memref<98xf32, #tpu.memory_space<smem>>
      %cst_154 = arith.constant 2.500000e-01 : f32
      %264 = arith.mulf %263, %cst_154 : f32
      %c93 = arith.constant 93 : index
      %265 = memref.load %arg2[%c93] : memref<98xf32, #tpu.memory_space<smem>>
      %c6_155 = arith.constant 6 : index
      %c0_156 = arith.constant 0 : index
      %266 = vector.load %arg9[%c6_155, %c0_156] : memref<24x128xf32, #tpu.memory_space<vmem>>, vector<16x128xf32>
      %267 = vector.broadcast %264 : f32 to vector<16x128xf32>
      %268 = arith.mulf %267, %266 : vector<16x128xf32>
      %269 = arith.addf %262, %268 : vector<16x128xf32>
      %c6_157 = arith.constant 6 : index
      %c0_158 = arith.constant 0 : index
      %270 = vector.load %arg10[%c6_157, %c0_158] : memref<24x128xf32, #tpu.memory_space<vmem>>, vector<16x128xf32>
      %271 = vector.broadcast %265 : f32 to vector<16x128xf32>
      %272 = arith.mulf %271, %270 : vector<16x128xf32>
      %273 = arith.addf %269, %272 : vector<16x128xf32>
      %c3_159 = arith.constant 3 : index
      %274 = memref.load %arg2[%c3_159] : memref<98xf32, #tpu.memory_space<smem>>
      %cst_160 = arith.constant 2.500000e-01 : f32
      %275 = arith.mulf %274, %cst_160 : f32
      %c52 = arith.constant 52 : index
      %276 = memref.load %arg2[%c52] : memref<98xf32, #tpu.memory_space<smem>>
      %c0_161 = arith.constant 0 : index
      %c0_162 = arith.constant 0 : index
      %277 = vector.load %arg7[%c0_161, %c0_162] : memref<24x128xf32, #tpu.memory_space<vmem>>, vector<16x128xf32>
      %278 = vector.broadcast %275 : f32 to vector<16x128xf32>
      %279 = arith.mulf %278, %277 : vector<16x128xf32>
      %280 = arith.addf %273, %279 : vector<16x128xf32>
      %c0_163 = arith.constant 0 : index
      %c0_164 = arith.constant 0 : index
      %281 = vector.load %arg8[%c0_163, %c0_164] : memref<24x128xf32, #tpu.memory_space<vmem>>, vector<16x128xf32>
      %282 = vector.broadcast %276 : f32 to vector<16x128xf32>
      %283 = arith.mulf %282, %281 : vector<16x128xf32>
      %284 = arith.addf %280, %283 : vector<16x128xf32>
      %c10 = arith.constant 10 : index
      %285 = memref.load %arg2[%c10] : memref<98xf32, #tpu.memory_space<smem>>
      %cst_165 = arith.constant 2.500000e-01 : f32
      %286 = arith.mulf %285, %cst_165 : f32
      %c59 = arith.constant 59 : index
      %287 = memref.load %arg2[%c59] : memref<98xf32, #tpu.memory_space<smem>>
      %c1_166 = arith.constant 1 : index
      %c0_167 = arith.constant 0 : index
      %288 = vector.load %arg7[%c1_166, %c0_167] : memref<24x128xf32, #tpu.memory_space<vmem>>, vector<16x128xf32>
      %289 = vector.broadcast %286 : f32 to vector<16x128xf32>
      %290 = arith.mulf %289, %288 : vector<16x128xf32>
      %291 = arith.addf %284, %290 : vector<16x128xf32>
      %c1_168 = arith.constant 1 : index
      %c0_169 = arith.constant 0 : index
      %292 = vector.load %arg8[%c1_168, %c0_169] : memref<24x128xf32, #tpu.memory_space<vmem>>, vector<16x128xf32>
      %293 = vector.broadcast %287 : f32 to vector<16x128xf32>
      %294 = arith.mulf %293, %292 : vector<16x128xf32>
      %295 = arith.addf %291, %294 : vector<16x128xf32>
      %c17 = arith.constant 17 : index
      %296 = memref.load %arg2[%c17] : memref<98xf32, #tpu.memory_space<smem>>
      %cst_170 = arith.constant 2.500000e-01 : f32
      %297 = arith.mulf %296, %cst_170 : f32
      %c66 = arith.constant 66 : index
      %298 = memref.load %arg2[%c66] : memref<98xf32, #tpu.memory_space<smem>>
      %c2_171 = arith.constant 2 : index
      %c0_172 = arith.constant 0 : index
      %299 = vector.load %arg7[%c2_171, %c0_172] : memref<24x128xf32, #tpu.memory_space<vmem>>, vector<16x128xf32>
      %300 = vector.broadcast %297 : f32 to vector<16x128xf32>
      %301 = arith.mulf %300, %299 : vector<16x128xf32>
      %302 = arith.addf %295, %301 : vector<16x128xf32>
      %c2_173 = arith.constant 2 : index
      %c0_174 = arith.constant 0 : index
      %303 = vector.load %arg8[%c2_173, %c0_174] : memref<24x128xf32, #tpu.memory_space<vmem>>, vector<16x128xf32>
      %304 = vector.broadcast %298 : f32 to vector<16x128xf32>
      %305 = arith.mulf %304, %303 : vector<16x128xf32>
      %306 = arith.addf %302, %305 : vector<16x128xf32>
      %c24 = arith.constant 24 : index
      %307 = memref.load %arg2[%c24] : memref<98xf32, #tpu.memory_space<smem>>
      %cst_175 = arith.constant 2.500000e-01 : f32
      %308 = arith.mulf %307, %cst_175 : f32
      %c73 = arith.constant 73 : index
      %309 = memref.load %arg2[%c73] : memref<98xf32, #tpu.memory_space<smem>>
      %c3_176 = arith.constant 3 : index
      %c0_177 = arith.constant 0 : index
      %310 = vector.load %arg7[%c3_176, %c0_177] : memref<24x128xf32, #tpu.memory_space<vmem>>, vector<16x128xf32>
      %311 = vector.broadcast %308 : f32 to vector<16x128xf32>
      %312 = arith.mulf %311, %310 : vector<16x128xf32>
      %313 = arith.addf %306, %312 : vector<16x128xf32>
      %c3_178 = arith.constant 3 : index
      %c0_179 = arith.constant 0 : index
      %314 = vector.load %arg8[%c3_178, %c0_179] : memref<24x128xf32, #tpu.memory_space<vmem>>, vector<16x128xf32>
      %315 = vector.broadcast %309 : f32 to vector<16x128xf32>
      %316 = arith.mulf %315, %314 : vector<16x128xf32>
      %317 = arith.addf %313, %316 : vector<16x128xf32>
      %c31 = arith.constant 31 : index
      %318 = memref.load %arg2[%c31] : memref<98xf32, #tpu.memory_space<smem>>
      %cst_180 = arith.constant 2.500000e-01 : f32
      %319 = arith.mulf %318, %cst_180 : f32
      %c80 = arith.constant 80 : index
      %320 = memref.load %arg2[%c80] : memref<98xf32, #tpu.memory_space<smem>>
      %c4_181 = arith.constant 4 : index
      %c0_182 = arith.constant 0 : index
      %321 = vector.load %arg7[%c4_181, %c0_182] : memref<24x128xf32, #tpu.memory_space<vmem>>, vector<16x128xf32>
      %322 = vector.broadcast %319 : f32 to vector<16x128xf32>
      %323 = arith.mulf %322, %321 : vector<16x128xf32>
      %324 = arith.addf %317, %323 : vector<16x128xf32>
      %c4_183 = arith.constant 4 : index
      %c0_184 = arith.constant 0 : index
      %325 = vector.load %arg8[%c4_183, %c0_184] : memref<24x128xf32, #tpu.memory_space<vmem>>, vector<16x128xf32>
      %326 = vector.broadcast %320 : f32 to vector<16x128xf32>
      %327 = arith.mulf %326, %325 : vector<16x128xf32>
      %328 = arith.addf %324, %327 : vector<16x128xf32>
      %c38 = arith.constant 38 : index
      %329 = memref.load %arg2[%c38] : memref<98xf32, #tpu.memory_space<smem>>
      %cst_185 = arith.constant 2.500000e-01 : f32
      %330 = arith.mulf %329, %cst_185 : f32
      %c87 = arith.constant 87 : index
      %331 = memref.load %arg2[%c87] : memref<98xf32, #tpu.memory_space<smem>>
      %c5_186 = arith.constant 5 : index
      %c0_187 = arith.constant 0 : index
      %332 = vector.load %arg7[%c5_186, %c0_187] : memref<24x128xf32, #tpu.memory_space<vmem>>, vector<16x128xf32>
      %333 = vector.broadcast %330 : f32 to vector<16x128xf32>
      %334 = arith.mulf %333, %332 : vector<16x128xf32>
      %335 = arith.addf %328, %334 : vector<16x128xf32>
      %c5_188 = arith.constant 5 : index
      %c0_189 = arith.constant 0 : index
      %336 = vector.load %arg8[%c5_188, %c0_189] : memref<24x128xf32, #tpu.memory_space<vmem>>, vector<16x128xf32>
      %337 = vector.broadcast %331 : f32 to vector<16x128xf32>
      %338 = arith.mulf %337, %336 : vector<16x128xf32>
      %339 = arith.addf %335, %338 : vector<16x128xf32>
      %c45 = arith.constant 45 : index
      %340 = memref.load %arg2[%c45] : memref<98xf32, #tpu.memory_space<smem>>
      %cst_190 = arith.constant 2.500000e-01 : f32
      %341 = arith.mulf %340, %cst_190 : f32
      %c94 = arith.constant 94 : index
      %342 = memref.load %arg2[%c94] : memref<98xf32, #tpu.memory_space<smem>>
      %c6_191 = arith.constant 6 : index
      %c0_192 = arith.constant 0 : index
      %343 = vector.load %arg7[%c6_191, %c0_192] : memref<24x128xf32, #tpu.memory_space<vmem>>, vector<16x128xf32>
      %344 = vector.broadcast %341 : f32 to vector<16x128xf32>
      %345 = arith.mulf %344, %343 : vector<16x128xf32>
      %346 = arith.addf %339, %345 : vector<16x128xf32>
      %c6_193 = arith.constant 6 : index
      %c0_194 = arith.constant 0 : index
      %347 = vector.load %arg8[%c6_193, %c0_194] : memref<24x128xf32, #tpu.memory_space<vmem>>, vector<16x128xf32>
      %348 = vector.broadcast %342 : f32 to vector<16x128xf32>
      %349 = arith.mulf %348, %347 : vector<16x128xf32>
      %350 = arith.addf %346, %349 : vector<16x128xf32>
      %c0_195 = arith.constant 0 : index
      %c0_196 = arith.constant 0 : index
      %351 = vector.load %arg7[%c0_195, %c0_196] : memref<24x128xf32, #tpu.memory_space<vmem>>, vector<24x128xf32>
      %c127_i32 = arith.constant 127 : i32
      %352 = tpu.dynamic_rotate %351 by %c127_i32 dim 1 : vector<24x128xf32>, i32 -> vector<24x128xf32>
      %c0_197 = arith.constant 0 : index
      %c0_198 = arith.constant 0 : index
      %353 = vector.load %arg9[%c0_197, %c0_198] : memref<24x128xf32, #tpu.memory_space<vmem>>, vector<24x128xf32>
      tpu.vector_store %arg9[%c0_197, %c0_198], %352 {strides = array<i32>} : memref<24x128xf32, #tpu.memory_space<vmem>>, vector<24x128xf32>,
      %c0_199 = arith.constant 0 : index
      %c0_200 = arith.constant 0 : index
      %354 = vector.load %arg8[%c0_199, %c0_200] : memref<24x128xf32, #tpu.memory_space<vmem>>, vector<24x128xf32>
      %c127_i32_201 = arith.constant 127 : i32
      %355 = tpu.dynamic_rotate %354 by %c127_i32_201 dim 1 : vector<24x128xf32>, i32 -> vector<24x128xf32>
      %c0_202 = arith.constant 0 : index
      %c0_203 = arith.constant 0 : index
      %356 = vector.load %arg10[%c0_202, %c0_203] : memref<24x128xf32, #tpu.memory_space<vmem>>, vector<24x128xf32>
      tpu.vector_store %arg10[%c0_202, %c0_203], %355 {strides = array<i32>} : memref<24x128xf32, #tpu.memory_space<vmem>>, vector<24x128xf32>,
      %c4_204 = arith.constant 4 : index
      %357 = memref.load %arg2[%c4_204] : memref<98xf32, #tpu.memory_space<smem>>
      %cst_205 = arith.constant 2.500000e-01 : f32
      %358 = arith.mulf %357, %cst_205 : f32
      %c53 = arith.constant 53 : index
      %359 = memref.load %arg2[%c53] : memref<98xf32, #tpu.memory_space<smem>>
      %c0_206 = arith.constant 0 : index
      %c0_207 = arith.constant 0 : index
      %360 = vector.load %arg9[%c0_206, %c0_207] : memref<24x128xf32, #tpu.memory_space<vmem>>, vector<16x128xf32>
      %361 = vector.broadcast %358 : f32 to vector<16x128xf32>
      %362 = arith.mulf %361, %360 : vector<16x128xf32>
      %363 = arith.addf %350, %362 : vector<16x128xf32>
      %c0_208 = arith.constant 0 : index
      %c0_209 = arith.constant 0 : index
      %364 = vector.load %arg10[%c0_208, %c0_209] : memref<24x128xf32, #tpu.memory_space<vmem>>, vector<16x128xf32>
      %365 = vector.broadcast %359 : f32 to vector<16x128xf32>
      %366 = arith.mulf %365, %364 : vector<16x128xf32>
      %367 = arith.addf %363, %366 : vector<16x128xf32>
      %c11 = arith.constant 11 : index
      %368 = memref.load %arg2[%c11] : memref<98xf32, #tpu.memory_space<smem>>
      %cst_210 = arith.constant 2.500000e-01 : f32
      %369 = arith.mulf %368, %cst_210 : f32
      %c60 = arith.constant 60 : index
      %370 = memref.load %arg2[%c60] : memref<98xf32, #tpu.memory_space<smem>>
      %c1_211 = arith.constant 1 : index
      %c0_212 = arith.constant 0 : index
      %371 = vector.load %arg9[%c1_211, %c0_212] : memref<24x128xf32, #tpu.memory_space<vmem>>, vector<16x128xf32>
      %372 = vector.broadcast %369 : f32 to vector<16x128xf32>
      %373 = arith.mulf %372, %371 : vector<16x128xf32>
      %374 = arith.addf %367, %373 : vector<16x128xf32>
      %c1_213 = arith.constant 1 : index
      %c0_214 = arith.constant 0 : index
      %375 = vector.load %arg10[%c1_213, %c0_214] : memref<24x128xf32, #tpu.memory_space<vmem>>, vector<16x128xf32>
      %376 = vector.broadcast %370 : f32 to vector<16x128xf32>
      %377 = arith.mulf %376, %375 : vector<16x128xf32>
      %378 = arith.addf %374, %377 : vector<16x128xf32>
      %c18 = arith.constant 18 : index
      %379 = memref.load %arg2[%c18] : memref<98xf32, #tpu.memory_space<smem>>
      %cst_215 = arith.constant 2.500000e-01 : f32
      %380 = arith.mulf %379, %cst_215 : f32
      %c67 = arith.constant 67 : index
      %381 = memref.load %arg2[%c67] : memref<98xf32, #tpu.memory_space<smem>>
      %c2_216 = arith.constant 2 : index
      %c0_217 = arith.constant 0 : index
      %382 = vector.load %arg9[%c2_216, %c0_217] : memref<24x128xf32, #tpu.memory_space<vmem>>, vector<16x128xf32>
      %383 = vector.broadcast %380 : f32 to vector<16x128xf32>
      %384 = arith.mulf %383, %382 : vector<16x128xf32>
      %385 = arith.addf %378, %384 : vector<16x128xf32>
      %c2_218 = arith.constant 2 : index
      %c0_219 = arith.constant 0 : index
      %386 = vector.load %arg10[%c2_218, %c0_219] : memref<24x128xf32, #tpu.memory_space<vmem>>, vector<16x128xf32>
      %387 = vector.broadcast %381 : f32 to vector<16x128xf32>
      %388 = arith.mulf %387, %386 : vector<16x128xf32>
      %389 = arith.addf %385, %388 : vector<16x128xf32>
      %c25 = arith.constant 25 : index
      %390 = memref.load %arg2[%c25] : memref<98xf32, #tpu.memory_space<smem>>
      %cst_220 = arith.constant 2.500000e-01 : f32
      %391 = arith.mulf %390, %cst_220 : f32
      %c74 = arith.constant 74 : index
      %392 = memref.load %arg2[%c74] : memref<98xf32, #tpu.memory_space<smem>>
      %c3_221 = arith.constant 3 : index
      %c0_222 = arith.constant 0 : index
      %393 = vector.load %arg9[%c3_221, %c0_222] : memref<24x128xf32, #tpu.memory_space<vmem>>, vector<16x128xf32>
      %394 = vector.broadcast %391 : f32 to vector<16x128xf32>
      %395 = arith.mulf %394, %393 : vector<16x128xf32>
      %396 = arith.addf %389, %395 : vector<16x128xf32>
      %c3_223 = arith.constant 3 : index
      %c0_224 = arith.constant 0 : index
      %397 = vector.load %arg10[%c3_223, %c0_224] : memref<24x128xf32, #tpu.memory_space<vmem>>, vector<16x128xf32>
      %398 = vector.broadcast %392 : f32 to vector<16x128xf32>
      %399 = arith.mulf %398, %397 : vector<16x128xf32>
      %400 = arith.addf %396, %399 : vector<16x128xf32>
      %c32 = arith.constant 32 : index
      %401 = memref.load %arg2[%c32] : memref<98xf32, #tpu.memory_space<smem>>
      %cst_225 = arith.constant 2.500000e-01 : f32
      %402 = arith.mulf %401, %cst_225 : f32
      %c81 = arith.constant 81 : index
      %403 = memref.load %arg2[%c81] : memref<98xf32, #tpu.memory_space<smem>>
      %c4_226 = arith.constant 4 : index
      %c0_227 = arith.constant 0 : index
      %404 = vector.load %arg9[%c4_226, %c0_227] : memref<24x128xf32, #tpu.memory_space<vmem>>, vector<16x128xf32>
      %405 = vector.broadcast %402 : f32 to vector<16x128xf32>
      %406 = arith.mulf %405, %404 : vector<16x128xf32>
      %407 = arith.addf %400, %406 : vector<16x128xf32>
      %c4_228 = arith.constant 4 : index
      %c0_229 = arith.constant 0 : index
      %408 = vector.load %arg10[%c4_228, %c0_229] : memref<24x128xf32, #tpu.memory_space<vmem>>, vector<16x128xf32>
      %409 = vector.broadcast %403 : f32 to vector<16x128xf32>
      %410 = arith.mulf %409, %408 : vector<16x128xf32>
      %411 = arith.addf %407, %410 : vector<16x128xf32>
      %c39 = arith.constant 39 : index
      %412 = memref.load %arg2[%c39] : memref<98xf32, #tpu.memory_space<smem>>
      %cst_230 = arith.constant 2.500000e-01 : f32
      %413 = arith.mulf %412, %cst_230 : f32
      %c88 = arith.constant 88 : index
      %414 = memref.load %arg2[%c88] : memref<98xf32, #tpu.memory_space<smem>>
      %c5_231 = arith.constant 5 : index
      %c0_232 = arith.constant 0 : index
      %415 = vector.load %arg9[%c5_231, %c0_232] : memref<24x128xf32, #tpu.memory_space<vmem>>, vector<16x128xf32>
      %416 = vector.broadcast %413 : f32 to vector<16x128xf32>
      %417 = arith.mulf %416, %415 : vector<16x128xf32>
      %418 = arith.addf %411, %417 : vector<16x128xf32>
      %c5_233 = arith.constant 5 : index
      %c0_234 = arith.constant 0 : index
      %419 = vector.load %arg10[%c5_233, %c0_234] : memref<24x128xf32, #tpu.memory_space<vmem>>, vector<16x128xf32>
      %420 = vector.broadcast %414 : f32 to vector<16x128xf32>
      %421 = arith.mulf %420, %419 : vector<16x128xf32>
      %422 = arith.addf %418, %421 : vector<16x128xf32>
      %c46 = arith.constant 46 : index
      %423 = memref.load %arg2[%c46] : memref<98xf32, #tpu.memory_space<smem>>
      %cst_235 = arith.constant 2.500000e-01 : f32
      %424 = arith.mulf %423, %cst_235 : f32
      %c95 = arith.constant 95 : index
      %425 = memref.load %arg2[%c95] : memref<98xf32, #tpu.memory_space<smem>>
      %c6_236 = arith.constant 6 : index
      %c0_237 = arith.constant 0 : index
      %426 = vector.load %arg9[%c6_236, %c0_237] : memref<24x128xf32, #tpu.memory_space<vmem>>, vector<16x128xf32>
      %427 = vector.broadcast %424 : f32 to vector<16x128xf32>
      %428 = arith.mulf %427, %426 : vector<16x128xf32>
      %429 = arith.addf %422, %428 : vector<16x128xf32>
      %c6_238 = arith.constant 6 : index
      %c0_239 = arith.constant 0 : index
      %430 = vector.load %arg10[%c6_238, %c0_239] : memref<24x128xf32, #tpu.memory_space<vmem>>, vector<16x128xf32>
      %431 = vector.broadcast %425 : f32 to vector<16x128xf32>
      %432 = arith.mulf %431, %430 : vector<16x128xf32>
      %433 = arith.addf %429, %432 : vector<16x128xf32>
      %c0_240 = arith.constant 0 : index
      %c0_241 = arith.constant 0 : index
      %434 = vector.load %arg7[%c0_240, %c0_241] : memref<24x128xf32, #tpu.memory_space<vmem>>, vector<24x128xf32>
      %c126_i32 = arith.constant 126 : i32
      %435 = tpu.dynamic_rotate %434 by %c126_i32 dim 1 : vector<24x128xf32>, i32 -> vector<24x128xf32>
      %c0_242 = arith.constant 0 : index
      %c0_243 = arith.constant 0 : index
      %436 = vector.load %arg9[%c0_242, %c0_243] : memref<24x128xf32, #tpu.memory_space<vmem>>, vector<24x128xf32>
      tpu.vector_store %arg9[%c0_242, %c0_243], %435 {strides = array<i32>} : memref<24x128xf32, #tpu.memory_space<vmem>>, vector<24x128xf32>,
      %c0_244 = arith.constant 0 : index
      %c0_245 = arith.constant 0 : index
      %437 = vector.load %arg8[%c0_244, %c0_245] : memref<24x128xf32, #tpu.memory_space<vmem>>, vector<24x128xf32>
      %c126_i32_246 = arith.constant 126 : i32
      %438 = tpu.dynamic_rotate %437 by %c126_i32_246 dim 1 : vector<24x128xf32>, i32 -> vector<24x128xf32>
      %c0_247 = arith.constant 0 : index
      %c0_248 = arith.constant 0 : index
      %439 = vector.load %arg10[%c0_247, %c0_248] : memref<24x128xf32, #tpu.memory_space<vmem>>, vector<24x128xf32>
      tpu.vector_store %arg10[%c0_247, %c0_248], %438 {strides = array<i32>} : memref<24x128xf32, #tpu.memory_space<vmem>>, vector<24x128xf32>,
      %c5_249 = arith.constant 5 : index
      %440 = memref.load %arg2[%c5_249] : memref<98xf32, #tpu.memory_space<smem>>
      %cst_250 = arith.constant 2.500000e-01 : f32
      %441 = arith.mulf %440, %cst_250 : f32
      %c54 = arith.constant 54 : index
      %442 = memref.load %arg2[%c54] : memref<98xf32, #tpu.memory_space<smem>>
      %c0_251 = arith.constant 0 : index
      %c0_252 = arith.constant 0 : index
      %443 = vector.load %arg9[%c0_251, %c0_252] : memref<24x128xf32, #tpu.memory_space<vmem>>, vector<16x128xf32>
      %444 = vector.broadcast %441 : f32 to vector<16x128xf32>
      %445 = arith.mulf %444, %443 : vector<16x128xf32>
      %446 = arith.addf %433, %445 : vector<16x128xf32>
      %c0_253 = arith.constant 0 : index
      %c0_254 = arith.constant 0 : index
      %447 = vector.load %arg10[%c0_253, %c0_254] : memref<24x128xf32, #tpu.memory_space<vmem>>, vector<16x128xf32>
      %448 = vector.broadcast %442 : f32 to vector<16x128xf32>
      %449 = arith.mulf %448, %447 : vector<16x128xf32>
      %450 = arith.addf %446, %449 : vector<16x128xf32>
      %c12 = arith.constant 12 : index
      %451 = memref.load %arg2[%c12] : memref<98xf32, #tpu.memory_space<smem>>
      %cst_255 = arith.constant 2.500000e-01 : f32
      %452 = arith.mulf %451, %cst_255 : f32
      %c61 = arith.constant 61 : index
      %453 = memref.load %arg2[%c61] : memref<98xf32, #tpu.memory_space<smem>>
      %c1_256 = arith.constant 1 : index
      %c0_257 = arith.constant 0 : index
      %454 = vector.load %arg9[%c1_256, %c0_257] : memref<24x128xf32, #tpu.memory_space<vmem>>, vector<16x128xf32>
      %455 = vector.broadcast %452 : f32 to vector<16x128xf32>
      %456 = arith.mulf %455, %454 : vector<16x128xf32>
      %457 = arith.addf %450, %456 : vector<16x128xf32>
      %c1_258 = arith.constant 1 : index
      %c0_259 = arith.constant 0 : index
      %458 = vector.load %arg10[%c1_258, %c0_259] : memref<24x128xf32, #tpu.memory_space<vmem>>, vector<16x128xf32>
      %459 = vector.broadcast %453 : f32 to vector<16x128xf32>
      %460 = arith.mulf %459, %458 : vector<16x128xf32>
      %461 = arith.addf %457, %460 : vector<16x128xf32>
      %c19 = arith.constant 19 : index
      %462 = memref.load %arg2[%c19] : memref<98xf32, #tpu.memory_space<smem>>
      %cst_260 = arith.constant 2.500000e-01 : f32
      %463 = arith.mulf %462, %cst_260 : f32
      %c68 = arith.constant 68 : index
      %464 = memref.load %arg2[%c68] : memref<98xf32, #tpu.memory_space<smem>>
      %c2_261 = arith.constant 2 : index
      %c0_262 = arith.constant 0 : index
      %465 = vector.load %arg9[%c2_261, %c0_262] : memref<24x128xf32, #tpu.memory_space<vmem>>, vector<16x128xf32>
      %466 = vector.broadcast %463 : f32 to vector<16x128xf32>
      %467 = arith.mulf %466, %465 : vector<16x128xf32>
      %468 = arith.addf %461, %467 : vector<16x128xf32>
      %c2_263 = arith.constant 2 : index
      %c0_264 = arith.constant 0 : index
      %469 = vector.load %arg10[%c2_263, %c0_264] : memref<24x128xf32, #tpu.memory_space<vmem>>, vector<16x128xf32>
      %470 = vector.broadcast %464 : f32 to vector<16x128xf32>
      %471 = arith.mulf %470, %469 : vector<16x128xf32>
      %472 = arith.addf %468, %471 : vector<16x128xf32>
      %c26 = arith.constant 26 : index
      %473 = memref.load %arg2[%c26] : memref<98xf32, #tpu.memory_space<smem>>
      %cst_265 = arith.constant 2.500000e-01 : f32
      %474 = arith.mulf %473, %cst_265 : f32
      %c75 = arith.constant 75 : index
      %475 = memref.load %arg2[%c75] : memref<98xf32, #tpu.memory_space<smem>>
      %c3_266 = arith.constant 3 : index
      %c0_267 = arith.constant 0 : index
      %476 = vector.load %arg9[%c3_266, %c0_267] : memref<24x128xf32, #tpu.memory_space<vmem>>, vector<16x128xf32>
      %477 = vector.broadcast %474 : f32 to vector<16x128xf32>
      %478 = arith.mulf %477, %476 : vector<16x128xf32>
      %479 = arith.addf %472, %478 : vector<16x128xf32>
      %c3_268 = arith.constant 3 : index
      %c0_269 = arith.constant 0 : index
      %480 = vector.load %arg10[%c3_268, %c0_269] : memref<24x128xf32, #tpu.memory_space<vmem>>, vector<16x128xf32>
      %481 = vector.broadcast %475 : f32 to vector<16x128xf32>
      %482 = arith.mulf %481, %480 : vector<16x128xf32>
      %483 = arith.addf %479, %482 : vector<16x128xf32>
      %c33 = arith.constant 33 : index
      %484 = memref.load %arg2[%c33] : memref<98xf32, #tpu.memory_space<smem>>
      %cst_270 = arith.constant 2.500000e-01 : f32
      %485 = arith.mulf %484, %cst_270 : f32
      %c82 = arith.constant 82 : index
      %486 = memref.load %arg2[%c82] : memref<98xf32, #tpu.memory_space<smem>>
      %c4_271 = arith.constant 4 : index
      %c0_272 = arith.constant 0 : index
      %487 = vector.load %arg9[%c4_271, %c0_272] : memref<24x128xf32, #tpu.memory_space<vmem>>, vector<16x128xf32>
      %488 = vector.broadcast %485 : f32 to vector<16x128xf32>
      %489 = arith.mulf %488, %487 : vector<16x128xf32>
      %490 = arith.addf %483, %489 : vector<16x128xf32>
      %c4_273 = arith.constant 4 : index
      %c0_274 = arith.constant 0 : index
      %491 = vector.load %arg10[%c4_273, %c0_274] : memref<24x128xf32, #tpu.memory_space<vmem>>, vector<16x128xf32>
      %492 = vector.broadcast %486 : f32 to vector<16x128xf32>
      %493 = arith.mulf %492, %491 : vector<16x128xf32>
      %494 = arith.addf %490, %493 : vector<16x128xf32>
      %c40 = arith.constant 40 : index
      %495 = memref.load %arg2[%c40] : memref<98xf32, #tpu.memory_space<smem>>
      %cst_275 = arith.constant 2.500000e-01 : f32
      %496 = arith.mulf %495, %cst_275 : f32
      %c89 = arith.constant 89 : index
      %497 = memref.load %arg2[%c89] : memref<98xf32, #tpu.memory_space<smem>>
      %c5_276 = arith.constant 5 : index
      %c0_277 = arith.constant 0 : index
      %498 = vector.load %arg9[%c5_276, %c0_277] : memref<24x128xf32, #tpu.memory_space<vmem>>, vector<16x128xf32>
      %499 = vector.broadcast %496 : f32 to vector<16x128xf32>
      %500 = arith.mulf %499, %498 : vector<16x128xf32>
      %501 = arith.addf %494, %500 : vector<16x128xf32>
      %c5_278 = arith.constant 5 : index
      %c0_279 = arith.constant 0 : index
      %502 = vector.load %arg10[%c5_278, %c0_279] : memref<24x128xf32, #tpu.memory_space<vmem>>, vector<16x128xf32>
      %503 = vector.broadcast %497 : f32 to vector<16x128xf32>
      %504 = arith.mulf %503, %502 : vector<16x128xf32>
      %505 = arith.addf %501, %504 : vector<16x128xf32>
      %c47 = arith.constant 47 : index
      %506 = memref.load %arg2[%c47] : memref<98xf32, #tpu.memory_space<smem>>
      %cst_280 = arith.constant 2.500000e-01 : f32
      %507 = arith.mulf %506, %cst_280 : f32
      %c96 = arith.constant 96 : index
      %508 = memref.load %arg2[%c96] : memref<98xf32, #tpu.memory_space<smem>>
      %c6_281 = arith.constant 6 : index
      %c0_282 = arith.constant 0 : index
      %509 = vector.load %arg9[%c6_281, %c0_282] : memref<24x128xf32, #tpu.memory_space<vmem>>, vector<16x128xf32>
      %510 = vector.broadcast %507 : f32 to vector<16x128xf32>
      %511 = arith.mulf %510, %509 : vector<16x128xf32>
      %512 = arith.addf %505, %511 : vector<16x128xf32>
      %c6_283 = arith.constant 6 : index
      %c0_284 = arith.constant 0 : index
      %513 = vector.load %arg10[%c6_283, %c0_284] : memref<24x128xf32, #tpu.memory_space<vmem>>, vector<16x128xf32>
      %514 = vector.broadcast %508 : f32 to vector<16x128xf32>
      %515 = arith.mulf %514, %513 : vector<16x128xf32>
      %516 = arith.addf %512, %515 : vector<16x128xf32>
      %c0_285 = arith.constant 0 : index
      %c0_286 = arith.constant 0 : index
      %517 = vector.load %arg7[%c0_285, %c0_286] : memref<24x128xf32, #tpu.memory_space<vmem>>, vector<24x128xf32>
      %c125_i32 = arith.constant 125 : i32
      %518 = tpu.dynamic_rotate %517 by %c125_i32 dim 1 : vector<24x128xf32>, i32 -> vector<24x128xf32>
      %c0_287 = arith.constant 0 : index
      %c0_288 = arith.constant 0 : index
      %519 = vector.load %arg9[%c0_287, %c0_288] : memref<24x128xf32, #tpu.memory_space<vmem>>, vector<24x128xf32>
      tpu.vector_store %arg9[%c0_287, %c0_288], %518 {strides = array<i32>} : memref<24x128xf32, #tpu.memory_space<vmem>>, vector<24x128xf32>,
      %c0_289 = arith.constant 0 : index
      %c0_290 = arith.constant 0 : index
      %520 = vector.load %arg8[%c0_289, %c0_290] : memref<24x128xf32, #tpu.memory_space<vmem>>, vector<24x128xf32>
      %c125_i32_291 = arith.constant 125 : i32
      %521 = tpu.dynamic_rotate %520 by %c125_i32_291 dim 1 : vector<24x128xf32>, i32 -> vector<24x128xf32>
      %c0_292 = arith.constant 0 : index
      %c0_293 = arith.constant 0 : index
      %522 = vector.load %arg10[%c0_292, %c0_293] : memref<24x128xf32, #tpu.memory_space<vmem>>, vector<24x128xf32>
      tpu.vector_store %arg10[%c0_292, %c0_293], %521 {strides = array<i32>} : memref<24x128xf32, #tpu.memory_space<vmem>>, vector<24x128xf32>,
      %c6_294 = arith.constant 6 : index
      %523 = memref.load %arg2[%c6_294] : memref<98xf32, #tpu.memory_space<smem>>
      %cst_295 = arith.constant 2.500000e-01 : f32
      %524 = arith.mulf %523, %cst_295 : f32
      %c55 = arith.constant 55 : index
      %525 = memref.load %arg2[%c55] : memref<98xf32, #tpu.memory_space<smem>>
      %c0_296 = arith.constant 0 : index
      %c0_297 = arith.constant 0 : index
      %526 = vector.load %arg9[%c0_296, %c0_297] : memref<24x128xf32, #tpu.memory_space<vmem>>, vector<16x128xf32>
      %527 = vector.broadcast %524 : f32 to vector<16x128xf32>
      %528 = arith.mulf %527, %526 : vector<16x128xf32>
      %529 = arith.addf %516, %528 : vector<16x128xf32>
      %c0_298 = arith.constant 0 : index
      %c0_299 = arith.constant 0 : index
      %530 = vector.load %arg10[%c0_298, %c0_299] : memref<24x128xf32, #tpu.memory_space<vmem>>, vector<16x128xf32>
      %531 = vector.broadcast %525 : f32 to vector<16x128xf32>
      %532 = arith.mulf %531, %530 : vector<16x128xf32>
      %533 = arith.addf %529, %532 : vector<16x128xf32>
      %c13 = arith.constant 13 : index
      %534 = memref.load %arg2[%c13] : memref<98xf32, #tpu.memory_space<smem>>
      %cst_300 = arith.constant 2.500000e-01 : f32
      %535 = arith.mulf %534, %cst_300 : f32
      %c62 = arith.constant 62 : index
      %536 = memref.load %arg2[%c62] : memref<98xf32, #tpu.memory_space<smem>>
      %c1_301 = arith.constant 1 : index
      %c0_302 = arith.constant 0 : index
      %537 = vector.load %arg9[%c1_301, %c0_302] : memref<24x128xf32, #tpu.memory_space<vmem>>, vector<16x128xf32>
      %538 = vector.broadcast %535 : f32 to vector<16x128xf32>
      %539 = arith.mulf %538, %537 : vector<16x128xf32>
      %540 = arith.addf %533, %539 : vector<16x128xf32>
      %c1_303 = arith.constant 1 : index
      %c0_304 = arith.constant 0 : index
      %541 = vector.load %arg10[%c1_303, %c0_304] : memref<24x128xf32, #tpu.memory_space<vmem>>, vector<16x128xf32>
      %542 = vector.broadcast %536 : f32 to vector<16x128xf32>
      %543 = arith.mulf %542, %541 : vector<16x128xf32>
      %544 = arith.addf %540, %543 : vector<16x128xf32>
      %c20 = arith.constant 20 : index
      %545 = memref.load %arg2[%c20] : memref<98xf32, #tpu.memory_space<smem>>
      %cst_305 = arith.constant 2.500000e-01 : f32
      %546 = arith.mulf %545, %cst_305 : f32
      %c69 = arith.constant 69 : index
      %547 = memref.load %arg2[%c69] : memref<98xf32, #tpu.memory_space<smem>>
      %c2_306 = arith.constant 2 : index
      %c0_307 = arith.constant 0 : index
      %548 = vector.load %arg9[%c2_306, %c0_307] : memref<24x128xf32, #tpu.memory_space<vmem>>, vector<16x128xf32>
      %549 = vector.broadcast %546 : f32 to vector<16x128xf32>
      %550 = arith.mulf %549, %548 : vector<16x128xf32>
      %551 = arith.addf %544, %550 : vector<16x128xf32>
      %c2_308 = arith.constant 2 : index
      %c0_309 = arith.constant 0 : index
      %552 = vector.load %arg10[%c2_308, %c0_309] : memref<24x128xf32, #tpu.memory_space<vmem>>, vector<16x128xf32>
      %553 = vector.broadcast %547 : f32 to vector<16x128xf32>
      %554 = arith.mulf %553, %552 : vector<16x128xf32>
      %555 = arith.addf %551, %554 : vector<16x128xf32>
      %c27 = arith.constant 27 : index
      %556 = memref.load %arg2[%c27] : memref<98xf32, #tpu.memory_space<smem>>
      %cst_310 = arith.constant 2.500000e-01 : f32
      %557 = arith.mulf %556, %cst_310 : f32
      %c76 = arith.constant 76 : index
      %558 = memref.load %arg2[%c76] : memref<98xf32, #tpu.memory_space<smem>>
      %c3_311 = arith.constant 3 : index
      %c0_312 = arith.constant 0 : index
      %559 = vector.load %arg9[%c3_311, %c0_312] : memref<24x128xf32, #tpu.memory_space<vmem>>, vector<16x128xf32>
      %560 = vector.broadcast %557 : f32 to vector<16x128xf32>
      %561 = arith.mulf %560, %559 : vector<16x128xf32>
      %562 = arith.addf %555, %561 : vector<16x128xf32>
      %c3_313 = arith.constant 3 : index
      %c0_314 = arith.constant 0 : index
      %563 = vector.load %arg10[%c3_313, %c0_314] : memref<24x128xf32, #tpu.memory_space<vmem>>, vector<16x128xf32>
      %564 = vector.broadcast %558 : f32 to vector<16x128xf32>
      %565 = arith.mulf %564, %563 : vector<16x128xf32>
      %566 = arith.addf %562, %565 : vector<16x128xf32>
      %c34 = arith.constant 34 : index
      %567 = memref.load %arg2[%c34] : memref<98xf32, #tpu.memory_space<smem>>
      %cst_315 = arith.constant 2.500000e-01 : f32
      %568 = arith.mulf %567, %cst_315 : f32
      %c83 = arith.constant 83 : index
      %569 = memref.load %arg2[%c83] : memref<98xf32, #tpu.memory_space<smem>>
      %c4_316 = arith.constant 4 : index
      %c0_317 = arith.constant 0 : index
      %570 = vector.load %arg9[%c4_316, %c0_317] : memref<24x128xf32, #tpu.memory_space<vmem>>, vector<16x128xf32>
      %571 = vector.broadcast %568 : f32 to vector<16x128xf32>
      %572 = arith.mulf %571, %570 : vector<16x128xf32>
      %573 = arith.addf %566, %572 : vector<16x128xf32>
      %c4_318 = arith.constant 4 : index
      %c0_319 = arith.constant 0 : index
      %574 = vector.load %arg10[%c4_318, %c0_319] : memref<24x128xf32, #tpu.memory_space<vmem>>, vector<16x128xf32>
      %575 = vector.broadcast %569 : f32 to vector<16x128xf32>
      %576 = arith.mulf %575, %574 : vector<16x128xf32>
      %577 = arith.addf %573, %576 : vector<16x128xf32>
      %c41 = arith.constant 41 : index
      %578 = memref.load %arg2[%c41] : memref<98xf32, #tpu.memory_space<smem>>
      %cst_320 = arith.constant 2.500000e-01 : f32
      %579 = arith.mulf %578, %cst_320 : f32
      %c90 = arith.constant 90 : index
      %580 = memref.load %arg2[%c90] : memref<98xf32, #tpu.memory_space<smem>>
      %c5_321 = arith.constant 5 : index
      %c0_322 = arith.constant 0 : index
      %581 = vector.load %arg9[%c5_321, %c0_322] : memref<24x128xf32, #tpu.memory_space<vmem>>, vector<16x128xf32>
      %582 = vector.broadcast %579 : f32 to vector<16x128xf32>
      %583 = arith.mulf %582, %581 : vector<16x128xf32>
      %584 = arith.addf %577, %583 : vector<16x128xf32>
      %c5_323 = arith.constant 5 : index
      %c0_324 = arith.constant 0 : index
      %585 = vector.load %arg10[%c5_323, %c0_324] : memref<24x128xf32, #tpu.memory_space<vmem>>, vector<16x128xf32>
      %586 = vector.broadcast %580 : f32 to vector<16x128xf32>
      %587 = arith.mulf %586, %585 : vector<16x128xf32>
      %588 = arith.addf %584, %587 : vector<16x128xf32>
      %c48 = arith.constant 48 : index
      %589 = memref.load %arg2[%c48] : memref<98xf32, #tpu.memory_space<smem>>
      %cst_325 = arith.constant 2.500000e-01 : f32
      %590 = arith.mulf %589, %cst_325 : f32
      %c97 = arith.constant 97 : index
      %591 = memref.load %arg2[%c97] : memref<98xf32, #tpu.memory_space<smem>>
      %c6_326 = arith.constant 6 : index
      %c0_327 = arith.constant 0 : index
      %592 = vector.load %arg9[%c6_326, %c0_327] : memref<24x128xf32, #tpu.memory_space<vmem>>, vector<16x128xf32>
      %593 = vector.broadcast %590 : f32 to vector<16x128xf32>
      %594 = arith.mulf %593, %592 : vector<16x128xf32>
      %595 = arith.addf %588, %594 : vector<16x128xf32>
      %c6_328 = arith.constant 6 : index
      %c0_329 = arith.constant 0 : index
      %596 = vector.load %arg10[%c6_328, %c0_329] : memref<24x128xf32, #tpu.memory_space<vmem>>, vector<16x128xf32>
      %597 = vector.broadcast %591 : f32 to vector<16x128xf32>
      %598 = arith.mulf %597, %596 : vector<16x128xf32>
      %599 = arith.addf %595, %598 : vector<16x128xf32>
      %600 = vector.extract_strided_slice %599 {offsets = [0, 0], sizes = [16, 16], strides = [1, 1]} : vector<16x128xf32> to vector<16x16xf32>
      %601 = arith.negf %600 : vector<16x16xf32>
      %602 = math.exp %601 : vector<16x16xf32>
      %cst_330 = arith.constant 1.000000e+00 : f32
      %603 = vector.broadcast %cst_330 : f32 to vector<16x16xf32>
      %604 = arith.addf %603, %602 : vector<16x16xf32>
      %605 = arith.divf %603, %604 : vector<16x16xf32>
      %c0_331 = arith.constant 0 : index
      %c0_332 = arith.constant 0 : index
      %c0_333 = arith.constant 0 : index
      %c0_334 = arith.constant 0 : index
      %606 = vector.load %arg4[%c0_331, %c0_332, %c0_333, %c0_334] : memref<1x1x16x16xf32, #tpu.memory_space<vmem>>, vector<1x1x16x16xf32>
      %607 = vector.shape_cast %606 : vector<1x1x16x16xf32> to vector<16x16xf32>
      %608 = vector.shape_cast %605 : vector<16x16xf32> to vector<1x1x16x16xf32>
      tpu.vector_store %arg4[%c0_331, %c0_332, %c0_333, %c0_334], %608 {strides = array<i32>} : memref<1x1x16x16xf32, #tpu.memory_space<vmem>>, vector<1x1x16x16xf32>,
    } else {
    }
    return
  }
  func.func @transform_0(%arg0: i32, %arg1: i32) -> i32 {
    %c0_i32 = arith.constant 0 : i32
    %c0_i32_0 = arith.constant 0 : i32
    return %c0_i32 : i32
  }
  func.func @transform_1(%arg0: i32, %arg1: i32) -> (i32, i32, i32, i32) {
    %c0_i32 = arith.constant 0 : i32
    %c0_i32_0 = arith.constant 0 : i32
    %c0_i32_1 = arith.constant 0 : i32
    return %arg0, %arg1, %c0_i32, %c0_i32_0 : i32, i32, i32, i32
  }
  func.func @transform_2(%arg0: i32, %arg1: i32) -> (i32, i32, i32, i32) {
    %c0_i32 = arith.constant 0 : i32
    %c0_i32_0 = arith.constant 0 : i32
    %c0_i32_1 = arith.constant 0 : i32
    %c0_i32_2 = arith.constant 0 : i32
    return %arg0, %c0_i32, %c0_i32_0, %c0_i32_1 : i32, i32, i32, i32
  }
}

</mosaic_0001>

<bundles_post_ra>
// kernel: tpu_custom_call.1
= control target key start
LH: loop header
LB: loop body
LE: loop exit
PB: predicated region body
PF: predicated region fallthrough
CT: control target
= control target key end

     0   :  { %7 = vsyncpa [#allocation11], 0  ;;  %s2684_s0 = inlined_call_operand.hbm [shape: f32[98], index: 0, kind: input, shape index: {}]   ;;  %s2685_s1 = inlined_call_operand.hbm [shape: f32[2,4,16,16], index: 1, kind: input, shape index: {}]   ;;  %s2686_s2 = inlined_call_operand.hbm [shape: f32[2,1,16,16], index: 2, kind: output, shape index: {}]  }
   0x1   :  { %8 = vsyncpa [#allocation9], 0 }
   0x2   :  { %10 = vsyncpa [#allocation9 + $0x1], 0 }
   0x3   :  { %11 = vsyncpa [#allocation10], 0 }
   0x4   :  { %13 = vsyncpa [#allocation10 + $0x1], 0  ;;  %s1743_s9 = smov 0   ;;  %s1745_s10 = smov 0  }
   0x5   :  { %s1747_s11 = smov 0   ;;  %s1749_s12 = smov 0  }
   0x6   :  { %s1751_s13 = smov 0   ;;  %s1753_s14 = smov 0  }
   0x7 LB: > { %s1368_s15 = sadd.s32 4294967295, %s1711_s14   ;;  %s1369_s16 = sadd.s32 4294967294, %s1711_s14   ;;  %s1711_s14 = sphi %s1753_s14, %s19_s14   ;;  %s1707_s13 = sphi %s1751_s13, %s2785_s13   ;;  %s1703_s12 = sphi %s1749_s12, %s2784_s12   ;;  %s1699_s11 = sphi %s1747_s11, %s2783_s11   ;;  %s1695_s10 = sphi %s1745_s10, %s2782_s10   ;;  %s1691_s9 = sphi %s1743_s9, %s2781_s9  }
   0x8   : > { %s61_s17 = sadd.s32 1, %s1699_s11  ;;  %p68_p0 = scmp.ne.s32.totalorder %s1699_s11, %s1695_s10 }
   0x9   : > { %p69_p1 = scmp.eq.s32.totalorder %s1711_s14, 0  ;;  %p74_p2 = scmp.ne.s32.totalorder %s1695_s10, %s1691_s9 }
   0xa   : > { %p1781_p3 = scmp.eq.s32.totalorder %s1368_s15, 0  ;;  %p98_p4 = scmp.eq.s32.totalorder %s1368_s15, 1 }
   0xb   : > { %p70_p5 = por %p69_p1, %p68_p0  ;;  %p104_p6 = scmp.eq.s32.totalorder %s1369_s16, 1 }
   0xc   : > { %s2700_s18 = scalar_select %p1781_p3, 1, 0 }
   0xd   : > { %p1787_p7 = por %p1781_p3, %p74_p2  ;;  %p1791_p8 = por %p98_p4, %p68_p0 }
   0xe   : > { %p1795_p9 = por %p104_p6, %p74_p2  ;;  %p1370_p10 = scmp.ge.s32.totalorder %s1711_s14, 1 }
   0xf   : > { %s2701_s19 = scalar_select %p1787_p7, 1, 0 }
  0x10   : > { %s2702_s20 = scalar_select %p1791_p8, 1, 0 }
  0x11   : > { %s2703_s21 = scalar_select %p1795_p9, 1, 0 }
  0x12   : > { %p111_p11 = scmp.lt.s32.totalorder %s1711_s14, 3  ;;  %p1507_p1 = scmp.lt.s32.totalorder %s1711_s14, 2 }
  0x13   : > { %s133_s23 = sand.u32 1, %s1699_s11   ;;  %s31_s25 = sadd.s32 1, %s1707_s13 }
  0x14   : > { %p1802_p13 = pnand %p1370_p10, %p111_p11  ;;  %p1810_p0 = pnand %p1507_p1, %p70_p5 }
  0x15   : > { %s1373_s26 = sshll.u32 %s133_s23, 6  ;;  %p33_p4 = scmp.ge.s32.totalorder %s31_s25, 2 }
  0x16   : > { %p1494_p7 = pneg %p1802_p13  ;;  %s1582_s29 = scalar_lea.hbm %s2684_s0, 16 }
  0x17   : > { %p1583_p6 = scmp.ne.s32.totalorder %s2684_s0, %s1582_s29  ;;  %p1589_p5 = scmp.lt.u32.totalorder %s1582_s29, %s2684_s0 }
  0x18   : > { %p1495_p2 = pnand %p1494_p7, %p1781_p3 }
  0x1a   : > { %p1584_p10 = pneg %p1495_p2 }
  0x1c   : > { %p1585_p11 = pnand %p1584_p10, %p1583_p6 }
  0x1e   : > { %p1586_p12 = pneg %p1585_p11 }
  0x20   : > { %p1591_p1 = pnand %p1589_p5, %p1586_p12 }
  0x22   : > { %1594 = shalt.err (!%p1591_p1)
}
  0x23   : > { %s1713_s6 = smov [#allocation8]   ;;  %s2787_s25 = smov (%p33_p4, %s31_s25), 0 }
  0x24   : > { %1497 = dma.hbm_to_smem (!%p1495_p2), %s2684_s0, 16, %s1713_s6, [#allocation11]  }
  0x25   : > { %s1484_s15 = sshll.u32 %s1707_s13, 10  ;;  %s56_s16 = ssub.s32 %s1707_s13, %s2787_s25 }
  0x26   : > { %s1837_s29 = scalar_lea.hbm %s2685_s1, %s1484_s15  ;;  %p59_p7 = scmp.eq.s32.totalorder %s56_s16, 0 }
  0x27   : > { %s137_s30 = scalar_lea.vmem [#allocation12], %s1373_s26  ;;  %s1846_s5 = scalar_lea.sflag [#allocation9], %s133_s23 }
  0x28   : > { %s147_s3 = sshll.u32 %s137_s30, 4  ;;  %s1595_s6 = scalar_lea.hbm %s1837_s29, 1024  ;;  %s1839_s3 = int_to_ptr.vmem [resolvable:$true] %s147_s3 }
  0x29   : > { %s1844_s4 = scalar_select %p59_p7, %s1699_s11, %s61_s17  }
  0x2a   : > { %p1596_p12 = scmp.ne.s32.totalorder %s1837_s29, %s1595_s6  ;;  %p1597_p2 = pneg %p1810_p0 }
  0x2b   : > { %s1600_s26 = scalar_lea.hbm %s2685_s1, 2048  ;;  %p1601_p10 = scmp.lt.u32.totalorder %s1837_s29, %s2685_s1 }
  0x2c   : > { %p1598_p4 = pnand %p1597_p2, %p1596_p12  ;;  %p1602_p11 = scmp.lt.u32.totalorder %s1600_s26, %s1595_s6 }
  0x2d   : > { %p1604_p1 = scmp.lt.u32.totalorder %s1595_s6, %s1837_s29 }
  0x2e   : > { %p1599_p6 = pneg %p1598_p4  ;;  %p1603_p5 = por %p1602_p11, %p1601_p10 }
  0x30   : > { %p1605_p7 = por %p1604_p1, %p1603_p5 }
  0x32   : > { %p1606_p9 = pnand %p1605_p7, %p1599_p6 }
  0x34   : > { %1609 = shalt.err (!%p1606_p9)
}
  0x35   : > { %s1610_s17 = scalar_lea.vmem %s1839_s3, 1024  ;;  %s1714_s23 = smov [#allocation12]  }
  0x36   : > { %p1611_p12 = scmp.ne.s32.totalorder %s1839_s3, %s1610_s17  ;;  %s1615_s27 = sshll.u32 %s1714_s23, 4  ;;  %s1616_s27 = int_to_ptr.vmem [resolvable:$false] %s1615_s27 }
  0x37   : > { %s1617_s28 = scalar_lea.vmem %s1616_s27, 2048  ;;  %p1618_p3 = scmp.lt.s32.totalorder %s1839_s3, %s1616_s27 }
  0x38   : > { %p1613_p4 = pnand %p1611_p12, %p1597_p2  ;;  %p1619_p10 = scmp.lt.s32.totalorder %s1617_s28, %s1610_s17 }
  0x3a   : > { %p1614_p8 = pneg %p1613_p4  ;;  %p1620_p11 = por %p1619_p10, %p1618_p3 }
  0x3c   : > { %p1621_p5 = pnand %p1620_p11, %p1614_p8 }
  0x3e   : > { %1624 = shalt.err (!%p1621_p5)
}
  0x3f   : > { %s1715_s30 = smov 128   ;;  %s1716_s6 = smov 8  }
  0x40   : > { %1501 = dma.hbm_to_vmem [thread:$0]  (!%p1810_p0), %s1837_s29, 1024, %s1839_s3, %s1846_s5, %s1715_s30, %s1715_s30, %s1716_s6  }
  0x41   : > { %159 = sbr.rel (%p1802_p13) target bundleno = 489 (0x1e9), region = 28 }
  0x48   : > { %p2706_p9 = scmp.ne.s32.totalorder %s2700_s18, 0 }
  0x4a   : > { %1678 = dma.done.wait (%p2706_p9), [#allocation11], 16  }
  0x4b   : > { %1680 = vsyncadd (%p2706_p9), [#allocation11], 4294967280  ;;  %s1881_s7 = sand.u32 1, %s1695_s10   ;;  %p2707_p3 = scmp.ne.s32.totalorder %s2701_s19, 0 }
  0x4c   : > { %s1378_s8 = sshll.u32 %s1881_s7, 6  ;;  %s166_s26 = scalar_lea.sflag [#allocation9], %s1881_s7 }
  0x4d   : > { %s169_s15 = scalar_lea.vmem [#allocation12], %s1378_s8 }
  0x4e   : > { %1682 = dma.done.wait (%p2707_p3), %s166_s26, 1024  }
  0x4f   : > { %1684 = vsyncadd (%p2707_p3), %s166_s26, 4294966272 }
  0x50   : > { %174 = sfence }
  0x51   : > { %vm196_vm0 = vcmask 130048   ;;  %v201_v0 = vld [vmem:[%s169_s15] sm:$0xff]  ;;  %v202_v1 = vld [vmem:[%s169_s15 + $0x8] sm:$0xff]  ;;  %v203_v2 = vld [vmem:[%s169_s15 + $0x10] sm:$0xff]  ;;  %v1717_v3 = vmov -inf   ;;  %v1718_v10 = vmov 0.0  }
  0x52   : > { %199 = vst.msk [vmem:[#allocation3] sm:$0xff] %vm196_vm0, %v1717_v3  ;;  %v204_v4 = vld [vmem:[%s169_s15 + $0x18] sm:$0xff]  ;;  %v205_v5 = vld [vmem:[%s169_s15 + $0x20] sm:$0xff]  ;;  %v206_v6 = vld [vmem:[%s169_s15 + $0x28] sm:$0xff]  ;;  %v219_v7 = vsel %vm196_vm0, %v202_v1, 0.0  ;;  %v232_v8 = vsel %vm196_vm0, %v201_v0, -inf }
  0x53   : > { %v233_v9 = vsel %vm196_vm0, %v203_v2, -inf  ;;  %256 = vst [vmem:[#allocation5] sm:$0xff] %v1718_v10  ;;  %257 = vst [vmem:[#allocation5 + $0x8] sm:$0xff] %v1718_v10  ;;  %v207_v11 = vld [vmem:[%s169_s15 + $0x30] sm:$0xff]  ;;  %v208_v12 = vld [vmem:[%s169_s15 + $0x38] sm:$0xff]  ;;  %v220_v13 = vsel %vm196_vm0, %v204_v4, 0.0 }
  0x54   : > { %197 = vst.msk [vmem:[#allocation2] sm:$0xff] %vm196_vm0, %v1718_v10  ;;  %198 = vst.msk [vmem:[#allocation2 + $0x8] sm:$0xff] %vm196_vm0, %v1718_v10  ;;  %v222_v14 = vsel %vm196_vm0, %v206_v6, 0.0  ;;  %v234_v15 = vsel %vm196_vm0, %v205_v5, -inf  ;;  %v221_v16 = vadd.f32 %v220_v13, %v219_v7  ;;  %v236_v18 = vsel %vm196_vm0, %v207_v11, -inf  ;;  %s1719_s18 = smov 3  }
  0x55   : > { %200 = vst.msk [vmem:[#allocation3 + $0x8] sm:$0xff] %vm196_vm0, %v1717_v3  ;;  %253 = vst [vmem:[#allocation4] sm:$0xff] %v1718_v10  ;;  %v235_v17 = vmax.f32 %v232_v8, %v234_v15  ;;  %v224_v19 = vsel %vm196_vm0, %v208_v12, 0.0  ;;  %v237_v20 = vmax.f32 %v233_v9, %v236_v18  ;;  %v243_v21 = vsel %vm196_vm0, %v208_v12, -inf  ;;  %s1720_s19 = smov 2   ;;  %s1721_s22 = smov 1  }
  0x56   : > { %254 = vst [vmem:[#allocation4 + $0x8] sm:$0xff] %v1718_v10  ;;  %255 = vst [vmem:[#allocation4 + $0x10] sm:$0xff] %v1718_v10  ;;  %v212_v22 = vsel %vm196_vm0, %v201_v0, 0.0  ;;  %v223_v23 = vadd.f32 %v222_v14, %v221_v16  ;;  %v213_v24 = vsel %vm196_vm0, %v203_v2, 0.0  ;;  %v215_v25 = vsel %vm196_vm0, %v205_v5, 0.0  ;;  %s1722_s24 = smov 127  }
  0x57   : > { %258 = vst [vmem:[#allocation5 + $0x10] sm:$0xff] %v1718_v10  ;;  %v238_v26 = vmax.f32 %v235_v17, %v237_v20  ;;  %v214_v27 = vadd.f32 %v213_v24, %v212_v22  ;;  %v239_v28 = vsel %vm196_vm0, %v202_v1, -inf  ;;  %v240_v29 = vsel %vm196_vm0, %v204_v4, -inf  ;;  %s1723_s29 = smov 126   ;;  %s1724_s3 = smov 125  }
  0x58   : > { %v225_v30 = vadd.f32 %v224_v19, %v223_v23  ;;  %v217_v31 = vsel %vm196_vm0, %v207_v11, 0.0  ;;  %v241_v32 = vsel %vm196_vm0, %v206_v6, -inf  ;;  %v244_v33 = vmax.f32 %v240_v29, %v243_v21  ;;  %s291_s5 = sld [smem:[#allocation8]]  ;;  %s1925_s16 = sld [smem:[#allocation8 + $0x31]] }
  0x59   : > { %v230_v34 = vld [vmem:[#allocation3] sm:$0xff]  ;;  %v216_v36 = vadd.f32 %v215_v25, %v214_v27  ;;  %v242_v37 = vmax.f32 %v239_v28, %v241_v32  ;;  %s1381_s17 = sld [smem:[#allocation8 + $0x7]]  ;;  %s1927_s27 = sld [smem:[#allocation8 + $0xe]] }
  0x5a   : > { %v246_v38 = vmax.f32 %v230_v34, %v238_v26  ;;  %s1929_s28 = sld [smem:[#allocation8 + $0x38]]  ;;  %s1932_s6 = sld [smem:[#allocation8 + $0x15]] }
  0x5b   : > { %v210_v35 = vld [vmem:[#allocation2 + $0x8] sm:$0xff]  ;;  %v209_v40 = vld [vmem:[#allocation2] sm:$0xff]  ;;  %v218_v42 = vadd.f32 %v217_v31, %v216_v36  ;;  %v245_v43 = vmax.f32 %v242_v37, %v244_v33  ;;  %s1934_s8 = sld [smem:[#allocation8 + $0x3f]]  ;;  %s1937_s15 = sld [smem:[#allocation8 + $0x1c]] }
  0x5c   : > { %v227_v39 = vadd.f32 %v225_v30, %v210_v35  ;;  %v231_v41 = vld [vmem:[#allocation3 + $0x8] sm:$0xff]  ;;  %248 = vst.msk [vmem:[#allocation3] sm:$0xff] %vm196_vm0, %v246_v38  ;;  %p2778_p13 = scmp.ne.s32.totalorder %s2702_s20, 0 }
  0x5d   : > { %v226_v44 = vadd.f32 %v218_v42, %v209_v40  ;;  %v247_v45 = vmax.f32 %v231_v41, %v245_v43 }
  0x5e   : > { %229 = vst.msk [vmem:[#allocation2 + $0x8] sm:$0xff] %vm196_vm0, %v227_v39  ;;  %s292_s23 = smul.f32 0.25, %s291_s5  ;;  %v303_v60 = vstv %s1925_s16  ;;  %s1988_s5 = sld [smem:[#allocation8 + $0x54]] }
  0x5f   : > { %228 = vst.msk [vmem:[#allocation2] sm:$0xff] %vm196_vm0, %v226_v44  ;;  %249 = vst.msk [vmem:[#allocation3 + $0x8] sm:$0xff] %vm196_vm0, %v247_v45  ;;  %s309_s30 = smul.f32 0.25, %s1381_s17  ;;  %s1991_s17 = sld [smem:[#allocation8 + $0x1]] }
  0x60   : > { %v296_v61 = vstv %s292_s23  ;;  %s326_s26 = smul.f32 0.25, %s1927_s27  ;;  %v320_v5 = vstv %s1929_s28  ;;  %s1996_s23 = sld [smem:[#allocation8 + $0x5b]] }
  0x61   : > { %v313_v2 = vstv %s309_s30  ;;  %v337_v32 = vstv %s1934_s8  ;;  %s2011_s28 = sld [smem:[#allocation8 + $0x8]]  ;;  %s2033_s30 = sld [smem:[#allocation8 + $0x32]] }
  0x62   : > { %v330_v22 = vstv %s326_s26  ;;  %s2055_s8 = sld [smem:[#allocation8 + $0xf]]  ;;  %s2073_s26 = sld [smem:[#allocation8 + $0x39]] }
  0x63   : > { %v263_v46 = vld [vmem:[#allocation3] sm:$0xff] }
  0x64   : > { %265 = vst.msk [vmem:[#allocation5 + $0x3] sm:$0xff] %vm196_vm0, %v263_v46 }
  0x65   : > { %v260_v47 = vld [vmem:[#allocation2 + $0x8] sm:$0xff] }
  0x66   : > { %262 = vst.msk [vmem:[#allocation4 + $0xb] sm:$0xff] %vm196_vm0, %v260_v47  ;;  %v259_v48 = vld [vmem:[#allocation2] sm:$0xff]  ;;  %v264_v49 = vld [vmem:[#allocation3 + $0x8] sm:$0xff] }
  0x67   : > { %261 = vst.msk [vmem:[#allocation4 + $0x3] sm:$0xff] %vm196_vm0, %v259_v48  ;;  %266 = vst.msk [vmem:[#allocation5 + $0xb] sm:$0xff] %vm196_vm0, %v264_v49 }
  0x6b   : > { %v279_v50 = vld [vmem:[#allocation5] sm:$0xff] }
  0x6c   : > { %282 = vrot.lane.b32.xlu1 %v279_v50, %s1719_s18 }
  0x6d   : > { %v269_v55 = vld [vmem:[#allocation4 + $0x10] sm:$0xff] }
  0x6e   : > { %v1917_v51 = vld [vmem:[#allocation4] sm:$0xff]  ;;  %v268_v53 = vld [vmem:[#allocation4 + $0x8] sm:$0xff] }
  0x6f   : > { %2708 = vst [vmem:[#allocation17_spill] sm:$0xff] %v1917_v51  ;;  %270 = vrot.lane.b32.xlu0 %v1917_v51, %s1719_s18  ;;  %v280_v52 = vld [vmem:[#allocation5 + $0x8] sm:$0xff]  ;;  %v281_v54 = vld [vmem:[#allocation5 + $0x10] sm:$0xff] }
  0x70   : > { %284 = vrot.lane.b32.xlu1 %v280_v52, %s1719_s18 }
  0x73   : > { %272 = vrot.lane.b32.xlu0 %v268_v53, %s1719_s18 }
  0x74   : > { %286 = vrot.lane.b32.xlu1 %v281_v54, %s1719_s18 }
  0x77   : > { %274 = vrot.lane.b32.xlu0 %v269_v55, %s1719_s18  ;;  %s1942_s18 = sld [smem:[#allocation8 + $0x46]] }
  0x78   : > { %415 = vrot.lane.b32.xlu1 %v268_v53, %s1720_s19 }
  0x7b   : > { %413 = vrot.lane.b32.xlu0 %v1917_v51, %s1720_s19 }
  0x7c   : > { %427 = vrot.lane.b32.xlu1 %v280_v52, %s1720_s19 }
  0x7f   : > { %425 = vrot.lane.b32.xlu0 %v279_v50, %s1720_s19 }
  0x80   : > { %429 = vrot.lane.b32.xlu1 %v281_v54, %s1720_s19 }
  0x83   : > { %417 = vrot.lane.b32.xlu0 %v269_v55, %s1720_s19  ;;  %s343_s19 = smul.f32 0.25, %s1932_s6 }
  0x84   : > { %558 = vrot.lane.b32.xlu1 %v268_v53, %s1721_s22  ;;  %s435_s6 = smul.f32 0.25, %s1991_s17 }
  0x85   : > { %v347_v44 = vstv %s343_s19  ;;  %s2086_s19 = sld [smem:[#allocation8 + $0x40]] }
  0x87   : > { %556 = vrot.lane.b32.xlu0 %v1917_v51, %s1721_s22 }
  0x88   : > { %570 = vrot.lane.b32.xlu1 %v280_v52, %s1721_s22 }
  0x8b   : > { %568 = vrot.lane.b32.xlu0 %v279_v50, %s1721_s22 }
  0x8c   : > { %572 = vrot.lane.b32.xlu1 %v281_v54, %s1721_s22 }
  0x8f   : > { %560 = vrot.lane.b32.xlu0 %v269_v55, %s1721_s22  ;;  %s1957_s22 = sld [smem:[#allocation8 + $0x23]] }
  0x90   : > { %820 = vrot.lane.b32.xlu1 %v268_v53, %s1722_s24 }
  0x93   : > { %818 = vrot.lane.b32.xlu0 %v1917_v51, %s1722_s24 }
  0x94   : > { %832 = vrot.lane.b32.xlu1 %v280_v52, %s1722_s24 }
  0x95   : > { %s377_s16 = smul.f32 0.25, %s1957_s22 }
  0x96   : > { %s469_s22 = smul.f32 0.25, %s2055_s8 }
  0x97   : > { %830 = vrot.lane.b32.xlu0 %v279_v50, %s1722_s24 }
  0x98   : > { %834 = vrot.lane.b32.xlu1 %v281_v54, %s1722_s24 }
  0x9b   : > { %822 = vrot.lane.b32.xlu0 %v269_v55, %s1722_s24  ;;  %s1971_s24 = sld [smem:[#allocation8 + $0x4d]] }
  0x9c   : > { %963 = vrot.lane.b32.xlu1 %v268_v53, %s1723_s29 }
  0x9f   : > { %961 = vrot.lane.b32.xlu0 %v1917_v51, %s1723_s29 }
  0xa0   : > { %975 = vrot.lane.b32.xlu1 %v280_v52, %s1723_s29 }
  0xa3   : > { %973 = vrot.lane.b32.xlu0 %v279_v50, %s1723_s29 }
  0xa4   : > { %977 = vrot.lane.b32.xlu1 %v281_v54, %s1723_s29 }
  0xa7   : > { %965 = vrot.lane.b32.xlu0 %v269_v55, %s1723_s29  ;;  %s360_s29 = smul.f32 0.25, %s1937_s15 }
  0xa8   : > { %1106 = vrot.lane.b32.xlu1 %v268_v53, %s1724_s3  ;;  %s452_s15 = smul.f32 0.25, %s2011_s28 }
  0xab   : > { %1104 = vrot.lane.b32.xlu0 %v1917_v51, %s1724_s3 }
  0xac   : > { %1118 = vrot.lane.b32.xlu1 %v280_v52, %s1724_s3 }
  0xaf   : > { %1116 = vrot.lane.b32.xlu0 %v279_v50, %s1724_s3  ;;  %v354_v50 = vstv %s1942_s18  ;;  %s2079_s18 = sld [smem:[#allocation8 + $0x16]] }
  0xb0   : > { %1120 = vrot.lane.b32.xlu1 %v281_v54, %s1724_s3 }
  0xb3   : > { %1108 = vrot.lane.b32.xlu0 %v269_v55, %s1724_s3  ;;  %s1984_s3 = sld [smem:[#allocation8 + $0x2a]] }
  0xb9   : > { %s394_s27 = smul.f32 0.25, %s1984_s3 }
  0xba   : > { %s486_s3 = smul.f32 0.25, %s2079_s18 }
  0xde   : > { %v283_v56 = vpop.permute.xlu1 %282 }
  0xdf   : > { %288 = vst [vmem:[#allocation7] sm:$0xff] %v283_v56  ;;  %v304_v0 = vmul.f32 %v303_v60, %v283_v56 }
  0xe1   : > { %v271_v57 = vpop.permute.xlu0 %270 }
  0xe2   : > { %276 = vst [vmem:[#allocation6] sm:$0xff] %v271_v57  ;;  %v285_v58 = vpop.permute.xlu1 %284  ;;  %v297_v1 = vmul.f32 %v296_v61, %v271_v57  ;;  %v364_v57 = vstv %s360_s29  ;;  %s2113_s29 = sld [smem:[#allocation8 + $0x47]] }
  0xe3   : > { %289 = vst [vmem:[#allocation7 + $0x8] sm:$0xff] %v285_v58  ;;  %v305_v11 = vmul.f32 %v303_v60, %v285_v58 }
  0xe4   : > { %v306_v10 = vadd.f32 %v304_v0, %v297_v1 }
  0xe5   : > { %v273_v59 = vpop.permute.xlu0 %272 }
  0xe6   : > { %277 = vst [vmem:[#allocation6 + $0x8] sm:$0xff] %v273_v59  ;;  %v287_v62 = vpop.permute.xlu1 %286  ;;  %v298_v17 = vmul.f32 %v296_v61, %v273_v59 }
  0xe7   : > { %290 = vst [vmem:[#allocation7 + $0x10] sm:$0xff] %v287_v62 }
  0xe8   : > { %v307_v37 = vadd.f32 %v305_v11, %v298_v17 }
  0xe9   : > { %v275_v63 = vpop.permute.xlu0 %274 }
  0xea   : > { %278 = vst [vmem:[#allocation6 + $0x10] sm:$0xff] %v275_v63  ;;  %v1939_v3 = vpop.permute.xlu1 %415  ;;  %v318_v4 = vld [vmem:[#allocation7 + $0x1] sm:$0xff]  ;;  %v371_v63 = vstv %s1971_s24  ;;  %s2099_s24 = sld [smem:[#allocation8 + $0x1d]] }
  0xeb   : > { %v335_v12 = vld [vmem:[#allocation7 + $0x2] sm:$0xff]  ;;  %v321_v27 = vmul.f32 %v320_v5, %v318_v4 }
  0xec   : > { %v352_v13 = vld [vmem:[#allocation7 + $0x3] sm:$0xff]  ;;  %v338_v46 = vmul.f32 %v337_v32, %v335_v12 }
  0xed   : > { %v311_v6 = vld [vmem:[#allocation6 + $0x1] sm:$0xff]  ;;  %v1944_v9 = vpop.permute.xlu0 %413  ;;  %v355_v59 = vmul.f32 %v354_v50, %v352_v13 }
  0xee   : > { %v328_v7 = vld [vmem:[#allocation6 + $0x2] sm:$0xff]  ;;  %v314_v18 = vmul.f32 %v313_v2, %v311_v6  ;;  %v1962_v26 = vpop.permute.xlu1 %427 }
  0xef   : > { %v345_v8 = vld [vmem:[#allocation6 + $0x3] sm:$0xff]  ;;  %v331_v39 = vmul.f32 %v330_v22, %v328_v7 }
  0xf0   : > { %v1946_v14 = vld [vmem:[#allocation7 + $0x4] sm:$0xff]  ;;  %v362_v19 = vld [vmem:[#allocation6 + $0x4] sm:$0xff]  ;;  %v316_v28 = vadd.f32 %v314_v18, %v306_v10  ;;  %v348_v54 = vmul.f32 %v347_v44, %v345_v8  ;;  %v381_v10 = vstv %s377_s16  ;;  %s2156_s16 = sld [smem:[#allocation8 + $0x4e]]  ;;  %s503_s17 = smul.f32 0.25, %s2099_s24 }
  0xf1   : > { %v1948_v15 = vld [vmem:[#allocation7 + $0x5] sm:$0xff]  ;;  %v1952_v20 = vld [vmem:[#allocation6 + $0x5] sm:$0xff]  ;;  %v1973_v36 = vpop.permute.xlu0 %425  ;;  %v1978_v42 = vld [vmem:[#allocation6 + $0xd] sm:$0xff] }
  0xf2   : > { %v1950_v16 = vld [vmem:[#allocation7 + $0x6] sm:$0xff]  ;;  %v1954_v21 = vld [vmem:[#allocation6 + $0x6] sm:$0xff]  ;;  %v323_v38 = vadd.f32 %v321_v27, %v316_v28  ;;  %v1980_v43 = vld [vmem:[#allocation6 + $0xe] sm:$0xff]  ;;  %v430_v45 = vpop.permute.xlu1 %429 }
  0xf3   : > { %v319_v23 = vld [vmem:[#allocation7 + $0x9] sm:$0xff]  ;;  %419 = vst [vmem:[#allocation6] sm:$0xff] %v1944_v9  ;;  %v312_v33 = vld [vmem:[#allocation6 + $0x9] sm:$0xff]  ;;  %431 = vst [vmem:[#allocation7] sm:$0xff] %v1973_v36 }
  0xf4   : > { %v336_v24 = vld [vmem:[#allocation7 + $0xa] sm:$0xff]  ;;  %v329_v34 = vld [vmem:[#allocation6 + $0xa] sm:$0xff]  ;;  %v315_v40 = vmul.f32 %v313_v2, %v312_v33  ;;  %v333_v47 = vadd.f32 %v331_v39, %v323_v38  ;;  %v322_v48 = vmul.f32 %v320_v5, %v319_v23  ;;  %v365_v2 = vmul.f32 %v364_v57, %v362_v19 }
  0xf5   : > { %v1959_v25 = vld [vmem:[#allocation7 + $0xb] sm:$0xff]  ;;  %v346_v35 = vld [vmem:[#allocation6 + $0xb] sm:$0xff]  ;;  %v418_v52 = vpop.permute.xlu0 %417  ;;  %v332_v56 = vmul.f32 %v330_v22, %v329_v34  ;;  %v339_v61 = vmul.f32 %v337_v32, %v336_v24  ;;  %v372_v23 = vmul.f32 %v371_v63, %v1946_v14  ;;  %v382_v39 = vmul.f32 %v381_v10, %v1952_v20 }
  0xf6   : > { %v1964_v29 = vld [vmem:[#allocation7 + $0xc] sm:$0xff]  ;;  %v1976_v41 = vld [vmem:[#allocation6 + $0xc] sm:$0xff]  ;;  %v317_v49 = vadd.f32 %v315_v40, %v307_v37  ;;  %v340_v53 = vadd.f32 %v338_v46, %v333_v47  ;;  %v1993_v58 = vpop.permute.xlu1 %558  ;;  %v349_v5 = vmul.f32 %v347_v44, %v346_v35  ;;  %v356_v27 = vmul.f32 %v354_v50, %v1959_v25 }
  0xf7   : > { %v1966_v30 = vld [vmem:[#allocation7 + $0xd] sm:$0xff]  ;;  %420 = vst [vmem:[#allocation6 + $0x8] sm:$0xff] %v1939_v3  ;;  %421 = vst [vmem:[#allocation6 + $0x10] sm:$0xff] %v418_v52  ;;  %v388_v35 = vstv %s1988_s5  ;;  %v366_v44 = vmul.f32 %v364_v57, %v1976_v41  ;;  %s2132_s5 = sld [smem:[#allocation8 + $0x24]] }
  0xf8   : > { %v1968_v31 = vld [vmem:[#allocation7 + $0xe] sm:$0xff]  ;;  %v324_v55 = vadd.f32 %v322_v48, %v317_v49  ;;  %v350_v60 = vadd.f32 %v348_v54, %v340_v53  ;;  %v398_v49 = vstv %s394_s27  ;;  %v373_v53 = vmul.f32 %v371_v63, %v1964_v29  ;;  %s2178_s27 = sld [smem:[#allocation8 + $0x55]] }
  0xf9   : > { %432 = vst [vmem:[#allocation7 + $0x8] sm:$0xff] %v1962_v26  ;;  %433 = vst [vmem:[#allocation7 + $0x10] sm:$0xff] %v430_v45  ;;  %v1998_v0 = vpop.permute.xlu0 %556  ;;  %v383_v63 = vmul.f32 %v381_v10, %v1978_v42  ;;  %v400_v10 = vmul.f32 %v398_v49, %v1980_v43 }
  0xfa   : > { %v334_v62 = vadd.f32 %v332_v56, %v324_v55  ;;  %v357_v1 = vadd.f32 %v355_v59, %v350_v60  ;;  %v2021_v22 = vpop.permute.xlu1 %570  ;;  %v389_v56 = vmul.f32 %v388_v35, %v1948_v15  ;;  %v399_v15 = vmul.f32 %v398_v49, %v1954_v21 }
  0xfc   : > { %v341_v4 = vadd.f32 %v339_v61, %v334_v62  ;;  %v367_v24 = vadd.f32 %v365_v2, %v357_v1  ;;  %v405_v61 = vstv %s1996_s23  ;;  %v439_v2 = vstv %s435_s6  ;;  %s2171_s23 = sld [smem:[#allocation8 + $0x2b]]  ;;  %s2205_s6 = sld [smem:[#allocation8 + $0x5c]] }
  0xfd   : > { %v2041_v25 = vpop.permute.xlu0 %568  ;;  %v407_v49 = vmul.f32 %v405_v61, %v1968_v31  ;;  %s520_s28 = smul.f32 0.25, %s2132_s5 }
  0xfe   : > { %v2000_v6 = vld [vmem:[#allocation6 + $0x2] sm:$0xff]  ;;  %v351_v28 = vadd.f32 %v349_v5, %v341_v4  ;;  %v2037_v14 = vld [vmem:[#allocation6 + $0xa] sm:$0xff]  ;;  %v374_v45 = vadd.f32 %v372_v23, %v367_v24  ;;  %v573_v52 = vpop.permute.xlu1 %572  ;;  %v390_v5 = vmul.f32 %v388_v35, %v1966_v30  ;;  %v456_v35 = vstv %s452_s15  ;;  %s2241_s15 = sld [smem:[#allocation8 + $0x33]] }
  0xff   : > { %v2002_v7 = vld [vmem:[#allocation6 + $0x3] sm:$0xff]  ;;  %v2039_v38 = vld [vmem:[#allocation6 + $0xb] sm:$0xff] }
 0x100   : > { %v2004_v8 = vld [vmem:[#allocation6 + $0x4] sm:$0xff]  ;;  %v2015_v17 = vld [vmem:[#allocation7 + $0x1] sm:$0xff]  ;;  %v358_v40 = vadd.f32 %v356_v27, %v351_v28  ;;  %v2045_v46 = vld [vmem:[#allocation6 + $0xc] sm:$0xff]  ;;  %v384_v55 = vadd.f32 %v382_v39, %v374_v45  ;;  %v406_v27 = vmul.f32 %v405_v61, %v1950_v16  ;;  %v446_v28 = vstv %s2033_s30  ;;  %s2191_s30 = sld [smem:[#allocation8 + $0x2]] }
 0x101   : > { %v2007_v11 = vld [vmem:[#allocation6 + $0x5] sm:$0xff]  ;;  %v2017_v18 = vld [vmem:[#allocation7 + $0x2] sm:$0xff]  ;;  %v2047_v47 = vld [vmem:[#allocation6 + $0xd] sm:$0xff]  ;;  %v561_v62 = vpop.permute.xlu0 %560 }
 0x102   : > { %v2009_v12 = vld [vmem:[#allocation6 + $0x6] sm:$0xff]  ;;  %v2019_v19 = vld [vmem:[#allocation7 + $0x3] sm:$0xff]  ;;  %v2049_v48 = vld [vmem:[#allocation6 + $0xe] sm:$0xff]  ;;  %v368_v54 = vadd.f32 %v366_v44, %v358_v40  ;;  %v391_v1 = vadd.f32 %v389_v56, %v384_v55  ;;  %v2081_v4 = vpop.permute.xlu1 %820  ;;  %v440_v40 = vmul.f32 %v439_v2, %v1944_v9  ;;  %v447_v55 = vmul.f32 %v446_v28, %v1973_v36  ;;  %s537_s8 = smul.f32 0.25, %s2171_s23 }
 0x103   : > { %v2013_v13 = vld [vmem:[#allocation6 + $0x1] sm:$0xff]  ;;  %v2035_v37 = vld [vmem:[#allocation6 + $0x9] sm:$0xff]  ;;  %2709 = vst [vmem:[#allocation18_spill] sm:$0xff] %v2081_v4  ;;  %v463_v56 = vstv %s2073_s26  ;;  %v441_v36 = vmul.f32 %v439_v2, %v1939_v3  ;;  %s2212_s26 = sld [smem:[#allocation8 + $0x9]] }
 0x104   : > { %v2025_v32 = vld [vmem:[#allocation7 + $0x4] sm:$0xff]  ;;  %562 = vst [vmem:[#allocation6] sm:$0xff] %v1998_v0  ;;  %563 = vst [vmem:[#allocation6 + $0x8] sm:$0xff] %v1993_v58  ;;  %v2066_v57 = vld [vmem:[#allocation7 + $0xc] sm:$0xff]  ;;  %v375_v29 = vadd.f32 %v373_v53, %v368_v54  ;;  %v401_v24 = vadd.f32 %v399_v15, %v391_v1  ;;  %v457_v31 = vmul.f32 %v456_v35, %v2013_v13 }
 0x105   : > { %v2027_v33 = vld [vmem:[#allocation7 + $0x5] sm:$0xff]  ;;  %v2068_v59 = vld [vmem:[#allocation7 + $0xd] sm:$0xff]  ;;  %564 = vst [vmem:[#allocation6 + $0x10] sm:$0xff] %v561_v62  ;;  %v2088_v42 = vpop.permute.xlu0 %818 }
 0x106   : > { %v2029_v34 = vld [vmem:[#allocation7 + $0x6] sm:$0xff]  ;;  %v2070_v60 = vld [vmem:[#allocation7 + $0xe] sm:$0xff]  ;;  %v385_v23 = vadd.f32 %v383_v63, %v375_v29  ;;  %2710 = vst [vmem:[#allocation19_spill] sm:$0xff] %v2088_v42  ;;  %v408_v39 = vadd.f32 %v406_v27, %v401_v24  ;;  %v2107_v43 = vpop.permute.xlu1 %832  ;;  %v473_v27 = vstv %s469_s22  ;;  %s578_s18 = smul.f32 0.25, %s2191_s30  ;;  %s2270_s22 = sld [smem:[#allocation8 + $0x3a]] }
 0x107   : > { %574 = vst [vmem:[#allocation7] sm:$0xff] %v2041_v25  ;;  %v2057_v50 = vld [vmem:[#allocation7 + $0x9] sm:$0xff]  ;;  %2712 = vst [vmem:[#allocation21_spill] sm:$0xff] %v2107_v43  ;;  %s2357_s30 = sld [smem:[#allocation8 + $0x3]] }
 0x108   : > { %v2059_v20 = vld [vmem:[#allocation7 + $0xa] sm:$0xff]  ;;  %v392_v21 = vadd.f32 %v390_v5, %v385_v23  ;;  %v442_v54 = vadd.f32 %v440_v40, %v408_v39 }
 0x109   : > { %v2061_v41 = vld [vmem:[#allocation7 + $0xb] sm:$0xff]  ;;  %v2121_v1 = vpop.permute.xlu0 %830  ;;  %s595_s24 = smul.f32 0.25, %s2212_s26  ;;  %s2372_s26 = sld [smem:[#allocation8 + $0x56]] }
 0x10a   : > { %575 = vst [vmem:[#allocation7 + $0x8] sm:$0xff] %v2021_v22  ;;  %576 = vst [vmem:[#allocation7 + $0x10] sm:$0xff] %v573_v52  ;;  %v402_v9 = vadd.f32 %v400_v10, %v392_v21  ;;  %v449_v61 = vadd.f32 %v447_v55, %v442_v54  ;;  %v835_v40 = vpop.permute.xlu1 %834  ;;  %v448_v54 = vmul.f32 %v446_v28, %v1962_v26 }
 0x10b   : > { %v2092_v44 = vld [vmem:[#allocation6 + $0x1] sm:$0xff]  ;;  %2713 = vst [vmem:[#allocation22_spill] sm:$0xff] %v2121_v1  ;;  %v464_v55 = vmul.f32 %v463_v56, %v2015_v17  ;;  %v474_v17 = vmul.f32 %v473_v27, %v2000_v6  ;;  %v465_v6 = vmul.f32 %v463_v56, %v2057_v50  ;;  %v507_v56 = vstv %s503_s17  ;;  %s2296_s17 = sld [smem:[#allocation8 + $0x48]] }
 0x10c   : > { %v2094_v45 = vld [vmem:[#allocation6 + $0x2] sm:$0xff]  ;;  %v2117_v29 = vld [vmem:[#allocation6 + $0xa] sm:$0xff]  ;;  %v409_v15 = vadd.f32 %v407_v49, %v402_v9  ;;  %v459_v9 = vadd.f32 %v457_v31, %v449_v61  ;;  %v458_v31 = vmul.f32 %v456_v35, %v2035_v37  ;;  %v497_v35 = vstv %s2113_s29  ;;  %s2277_s29 = sld [smem:[#allocation8 + $0x17]] }
 0x10d   : > { %v2096_v30 = vld [vmem:[#allocation6 + $0x3] sm:$0xff]  ;;  %v2119_v63 = vld [vmem:[#allocation6 + $0xb] sm:$0xff]  ;;  %v823_v26 = vpop.permute.xlu0 %822 }
 0x10e   : > { %v2101_v16 = vld [vmem:[#allocation6 + $0x4] sm:$0xff]  ;;  %v2125_v5 = vld [vmem:[#allocation6 + $0xc] sm:$0xff]  ;;  %v443_v49 = vadd.f32 %v441_v36, %v409_v15  ;;  %v466_v61 = vadd.f32 %v464_v55, %v459_v9  ;;  %v490_v36 = vstv %s486_s3  ;;  %v475_v55 = vmul.f32 %v473_v27, %v2037_v14  ;;  %s2282_s3 = sld [smem:[#allocation8 + $0x41]] }
 0x10f   : > { %v2103_v52 = vld [vmem:[#allocation6 + $0x5] sm:$0xff]  ;;  %v2127_v23 = vld [vmem:[#allocation6 + $0xd] sm:$0xff] }
 0x110   : > { %v2105_v53 = vld [vmem:[#allocation6 + $0x6] sm:$0xff]  ;;  %2714 = vst [vmem:[#allocation23_spill] sm:$0xff] %v2127_v23  ;;  %v2129_v24 = vld [vmem:[#allocation6 + $0xe] sm:$0xff]  ;;  %v480_v23 = vstv %s2086_s19  ;;  %v450_v28 = vadd.f32 %v448_v54, %v443_v49  ;;  %v476_v54 = vadd.f32 %v474_v17, %v466_v61  ;;  %s2260_s19 = sld [smem:[#allocation8 + $0x10]] }
 0x111   : > { %2711 = vst [vmem:[#allocation20_spill] sm:$0xff] %v2105_v53  ;;  %824 = vst [vmem:[#allocation6] sm:$0xff] %v2088_v42  ;;  %v2115_v62 = vld [vmem:[#allocation6 + $0x9] sm:$0xff]  ;;  %v2134_v21 = vld [vmem:[#allocation7 + $0x1] sm:$0xff]  ;;  %v481_v37 = vmul.f32 %v480_v23, %v2017_v18  ;;  %v2180_v9 = vpop.permute.xlu0 %961 }
 0x112   : > { %2715 = vst [vmem:[#allocation24_spill] sm:$0xff] %v2129_v24  ;;  %v2136_v10 = vld [vmem:[#allocation7 + $0x9] sm:$0xff]  ;;  %825 = vst [vmem:[#allocation6 + $0x8] sm:$0xff] %v2081_v4  ;;  %v460_v49 = vadd.f32 %v458_v31, %v450_v28  ;;  %v482_v31 = vmul.f32 %v480_v23, %v2059_v20  ;;  %s629_s23 = smul.f32 0.25, %s2277_s29 }
 0x113   : > { %v2138_v39 = vld [vmem:[#allocation7 + $0x2] sm:$0xff]  ;;  %v2140_v13 = vld [vmem:[#allocation7 + $0xa] sm:$0xff]  ;;  %826 = vst [vmem:[#allocation6 + $0x10] sm:$0xff] %v823_v26  ;;  %2718 = vst [vmem:[#allocation27_spill] sm:$0xff] %v2180_v9 }
 0x114   : > { %v2142_v3 = vld [vmem:[#allocation7 + $0x3] sm:$0xff]  ;;  %v2144_v2 = vld [vmem:[#allocation7 + $0xb] sm:$0xff]  ;;  %v467_v26 = vadd.f32 %v465_v6, %v460_v49  ;;  %v498_v49 = vmul.f32 %v497_v35, %v2019_v19  ;;  %v514_v6 = vstv %s2156_s16  ;;  %v499_v19 = vmul.f32 %v497_v35, %v2061_v41  ;;  %s2291_s16 = sld [smem:[#allocation8 + $0x1e]] }
 0x115   : > { %v2149_v42 = vld [vmem:[#allocation7 + $0x4] sm:$0xff]  ;;  %v2151_v24 = vld [vmem:[#allocation7 + $0xc] sm:$0xff] }
 0x116   : > { %v2153_v51 = vld [vmem:[#allocation7 + $0x5] sm:$0xff]  ;;  %v2158_v53 = vld [vmem:[#allocation7 + $0xd] sm:$0xff]  ;;  %v477_v27 = vadd.f32 %v475_v55, %v467_v26  ;;  %s612_s5 = smul.f32 0.25, %s2260_s19  ;;  %s2382_s19 = sld [smem:[#allocation8 + $0x5d]] }
 0x117   : > { %v2160_v4 = vld [vmem:[#allocation7 + $0x6] sm:$0xff]  ;;  %v2162_v15 = vld [vmem:[#allocation7 + $0xe] sm:$0xff] }
 0x118   : > { %2716 = vst [vmem:[#allocation25_spill] sm:$0xff] %v2162_v15  ;;  %836 = vst [vmem:[#allocation7] sm:$0xff] %v2121_v1  ;;  %v2173_v15 = vpop.permute.xlu1 %963 }
 0x119   : > { %837 = vst [vmem:[#allocation7 + $0x8] sm:$0xff] %v2107_v43  ;;  %838 = vst [vmem:[#allocation7 + $0x10] sm:$0xff] %v835_v40  ;;  %v491_v40 = vmul.f32 %v490_v36, %v2002_v7  ;;  %v483_v43 = vadd.f32 %v481_v37, %v476_v54  ;;  %v2184_v1 = vld [vmem:[#allocation6 + $0x1] sm:$0xff]  ;;  %v2207_v54 = vpop.permute.xlu0 %973  ;;  %v508_v37 = vmul.f32 %v507_v56, %v2004_v8 }
 0x11a   : > { %2717 = vst [vmem:[#allocation26_spill] sm:$0xff] %v2173_v15  ;;  %v2186_v28 = vld [vmem:[#allocation6 + $0x2] sm:$0xff]  ;;  %2724 = vst [vmem:[#allocation33_spill] sm:$0xff] %v2207_v54  ;;  %v2234_v35 = vld [vmem:[#allocation6 + $0xc] sm:$0xff] }
 0x11b   : > { %v2188_v50 = vld [vmem:[#allocation6 + $0x3] sm:$0xff]  ;;  %v493_v61 = vadd.f32 %v491_v40, %v483_v43  ;;  %v515_v40 = vmul.f32 %v514_v6, %v2025_v32  ;;  %2730 = vst [vmem:[#allocation39_spill] sm:$0xff] %v2234_v35  ;;  %v509_v35 = vmul.f32 %v507_v56, %v2045_v46  ;;  %v516_v46 = vmul.f32 %v514_v6, %v2066_v57 }
 0x11c   : > { %2719 = vst [vmem:[#allocation28_spill] sm:$0xff] %v2188_v50  ;;  %v2193_v18 = vpop.permute.xlu1 %975  ;;  %v2195_v17 = vld [vmem:[#allocation6 + $0x4] sm:$0xff] }
 0x11d   : > { %2720 = vst [vmem:[#allocation29_spill] sm:$0xff] %v2193_v18  ;;  %2721 = vst [vmem:[#allocation30_spill] sm:$0xff] %v2195_v17  ;;  %v2197_v7 = vld [vmem:[#allocation6 + $0x5] sm:$0xff]  ;;  %v492_v17 = vmul.f32 %v490_v36, %v2039_v38  ;;  %v500_v50 = vadd.f32 %v498_v49, %v493_v61  ;;  %v966_v61 = vpop.permute.xlu0 %965  ;;  %v2243_v49 = vld [vmem:[#allocation6 + $0xd] sm:$0xff] }
 0x11e   : > { %2722 = vst [vmem:[#allocation31_spill] sm:$0xff] %v2197_v7  ;;  %v2199_v14 = vld [vmem:[#allocation6 + $0x6] sm:$0xff]  ;;  %v484_v7 = vadd.f32 %v482_v31, %v477_v27  ;;  %2733 = vst [vmem:[#allocation42_spill] sm:$0xff] %v2243_v49 }
 0x11f   : > { %2723 = vst [vmem:[#allocation32_spill] sm:$0xff] %v2199_v14  ;;  %967 = vst [vmem:[#allocation6] sm:$0xff] %v2180_v9  ;;  %v524_v14 = vstv %s520_s28  ;;  %v510_v23 = vadd.f32 %v508_v37, %v500_v50  ;;  %v2216_v55 = vld [vmem:[#allocation6 + $0x9] sm:$0xff]  ;;  %s2348_s28 = sld [smem:[#allocation8 + $0x4f]] }
 0x120   : > { %v978_v20 = vpop.permute.xlu1 %977  ;;  %v494_v43 = vadd.f32 %v492_v17, %v484_v7  ;;  %v2218_v26 = vld [vmem:[#allocation7 + $0x1] sm:$0xff]  ;;  %v2220_v8 = vld [vmem:[#allocation7 + $0x9] sm:$0xff]  ;;  %v2222_v38 = vld [vmem:[#allocation6 + $0xa] sm:$0xff]  ;;  %v531_v7 = vstv %s2178_s27  ;;  %s2309_s27 = sld [smem:[#allocation8 + $0x25]] }
 0x121   : > { %2725 = vst [vmem:[#allocation34_spill] sm:$0xff] %v2222_v38  ;;  %v2224_v36 = vld [vmem:[#allocation7 + $0x2] sm:$0xff]  ;;  %v2226_v27 = vld [vmem:[#allocation7 + $0xa] sm:$0xff]  ;;  %v2228_v31 = vld [vmem:[#allocation6 + $0xb] sm:$0xff]  ;;  %v541_v38 = vstv %s537_s8  ;;  %v533_v6 = vmul.f32 %v531_v7, %v2068_v59  ;;  %s2367_s8 = sld [smem:[#allocation8 + $0x2c]] }
 0x122   : > { %2726 = vst [vmem:[#allocation35_spill] sm:$0xff] %v2226_v27  ;;  %2727 = vst [vmem:[#allocation36_spill] sm:$0xff] %v2228_v31  ;;  %v2230_v17 = vld [vmem:[#allocation7 + $0x3] sm:$0xff]  ;;  %v2232_v41 = vld [vmem:[#allocation7 + $0xb] sm:$0xff]  ;;  %v501_v31 = vadd.f32 %v499_v19, %v494_v43  ;;  %v532_v43 = vmul.f32 %v531_v7, %v2027_v33  ;;  %v548_v19 = vstv %s2205_s6  ;;  %s646_s6 = smul.f32 0.25, %s2291_s16 }
 0x123   : > { %2728 = vst [vmem:[#allocation37_spill] sm:$0xff] %v2230_v17  ;;  %2729 = vst [vmem:[#allocation38_spill] sm:$0xff] %v2232_v41  ;;  %v2236_v32 = vld [vmem:[#allocation7 + $0x4] sm:$0xff]  ;;  %v2238_v50 = vld [vmem:[#allocation7 + $0xc] sm:$0xff]  ;;  %v525_v41 = vmul.f32 %v524_v14, %v2007_v11  ;;  %v517_v17 = vadd.f32 %v515_v40, %v510_v23  ;;  %v2272_v23 = vpop.permute.xlu0 %1104  ;;  %v542_v40 = vmul.f32 %v541_v38, %v2009_v12 }
 0x124   : > { %2731 = vst [vmem:[#allocation40_spill] sm:$0xff] %v2236_v32  ;;  %2732 = vst [vmem:[#allocation41_spill] sm:$0xff] %v2238_v50  ;;  %v2245_v37 = vld [vmem:[#allocation7 + $0x5] sm:$0xff]  ;;  %v2247_v9 = vld [vmem:[#allocation7 + $0xd] sm:$0xff]  ;;  %v2262_v49 = vpop.permute.xlu1 %1106  ;;  %v511_v11 = vadd.f32 %v509_v35, %v501_v31  ;;  %v589_v31 = vstv %s2241_s15  ;;  %v550_v59 = vmul.f32 %v548_v19, %v2070_v60  ;;  %v616_v60 = vstv %s612_s5  ;;  %s2376_s15 = sld [smem:[#allocation8 + $0xa]]  ;;  %s2397_s5 = sld [smem:[#allocation8 + $0x3b]] }
 0x125   : > { %v2251_v32 = vld [vmem:[#allocation6 + $0xe] sm:$0xff]  ;;  %v2253_v50 = vld [vmem:[#allocation7 + $0x6] sm:$0xff]  ;;  %v2255_v27 = vld [vmem:[#allocation7 + $0xe] sm:$0xff]  ;;  %v527_v56 = vadd.f32 %v525_v41, %v517_v17  ;;  %v590_v7 = vmul.f32 %v589_v31, %v2041_v25 }
 0x126   : > { %968 = vst [vmem:[#allocation6 + $0x8] sm:$0xff] %v2173_v15  ;;  %969 = vst [vmem:[#allocation6 + $0x10] sm:$0xff] %v966_v61  ;;  %v526_v61 = vmul.f32 %v524_v14, %v2047_v47  ;;  %v518_v15 = vadd.f32 %v516_v46, %v511_v11  ;;  %v543_v14 = vmul.f32 %v541_v38, %v2049_v48  ;;  %v606_v11 = vstv %s2270_s22  ;;  %s697_s22 = smul.f32 0.25, %s2357_s30  ;;  %s2418_s30 = sld [smem:[#allocation8 + $0x49]] }
 0x127   : > { %979 = vst [vmem:[#allocation7] sm:$0xff] %v2207_v54  ;;  %980 = vst [vmem:[#allocation7 + $0x8] sm:$0xff] %v2193_v18  ;;  %v534_v54 = vadd.f32 %v532_v43, %v527_v56  ;;  %v582_v18 = vstv %s578_s18  ;;  %v2284_v12 = vpop.permute.xlu0 %1116  ;;  %s663_s18 = smul.f32 0.25, %s2309_s27 }
 0x128   : > { %981 = vst [vmem:[#allocation7 + $0x10] sm:$0xff] %v978_v20  ;;  %v528_v57 = vadd.f32 %v526_v61, %v518_v15  ;;  %v549_v20 = vmul.f32 %v548_v19, %v2029_v34  ;;  %v2286_v47 = vpop.permute.xlu1 %1118  ;;  %v583_v35 = vmul.f32 %v582_v18, %v1998_v0  ;;  %v599_v15 = vstv %s595_s24  ;;  %s2387_s24 = sld [smem:[#allocation8 + $0x34]]  ;;  %s680_s29 = smul.f32 0.25, %s2367_s8 }
 0x129   : > { %v544_v33 = vadd.f32 %v542_v40, %v534_v54  ;;  %v600_v48 = vmul.f32 %v599_v15, %v2092_v44  ;;  %v584_v0 = vmul.f32 %v582_v18, %v1993_v58  ;;  %s2422_s8 = sld [smem:[#allocation8 + $0x26]] }
 0x12a   : > { %v535_v17 = vadd.f32 %v533_v6, %v528_v57  ;;  %s714_s16 = smul.f32 0.25, %s2376_s15 }
 0x12b   : > { %v551_v41 = vadd.f32 %v549_v20, %v544_v33  ;;  %v1109_v25 = vpop.permute.xlu0 %1108 }
 0x12c   : > { %v545_v34 = vadd.f32 %v543_v14, %v535_v17  ;;  %v1121_v19 = vpop.permute.xlu1 %1120 }
 0x12d   : > { %v585_v54 = vadd.f32 %v583_v35, %v551_v41  ;;  %v2300_v56 = vld [vmem:[#allocation6 + $0x1] sm:$0xff]  ;;  %v2311_v57 = vld [vmem:[#allocation6 + $0x9] sm:$0xff] }
 0x12e   : > { %v552_v46 = vadd.f32 %v550_v59, %v545_v34  ;;  %v2302_v43 = vld [vmem:[#allocation6 + $0x2] sm:$0xff]  ;;  %v2313_v44 = vld [vmem:[#allocation7 + $0x1] sm:$0xff]  ;;  %v2317_v58 = vld [vmem:[#allocation6 + $0xa] sm:$0xff] }
 0x12f   : > { %v592_v38 = vadd.f32 %v590_v7, %v585_v54  ;;  %v2304_v40 = vld [vmem:[#allocation6 + $0x3] sm:$0xff]  ;;  %v2319_v18 = vld [vmem:[#allocation7 + $0x2] sm:$0xff]  ;;  %v2323_v20 = vld [vmem:[#allocation6 + $0xb] sm:$0xff] }
 0x130   : > { %2734 = vst [vmem:[#allocation43_spill] sm:$0xff] %v2304_v40  ;;  %v2306_v61 = vld [vmem:[#allocation6 + $0x4] sm:$0xff]  ;;  %2737 = vst [vmem:[#allocation46_spill] sm:$0xff] %v2323_v20  ;;  %v2325_v14 = vld [vmem:[#allocation7 + $0x3] sm:$0xff]  ;;  %v607_v20 = vmul.f32 %v606_v11, %v2134_v21  ;;  %v617_v21 = vmul.f32 %v616_v60, %v2094_v45  ;;  %v608_v45 = vmul.f32 %v606_v11, %v2136_v10 }
 0x131   : > { %2735 = vst [vmem:[#allocation44_spill] sm:$0xff] %v2306_v61  ;;  %v2315_v6 = vld [vmem:[#allocation7 + $0x9] sm:$0xff]  ;;  %2738 = vst [vmem:[#allocation47_spill] sm:$0xff] %v2325_v14  ;;  %v2329_v41 = vld [vmem:[#allocation6 + $0xc] sm:$0xff]  ;;  %v602_v7 = vadd.f32 %v600_v48, %v592_v38  ;;  %v586_v61 = vadd.f32 %v584_v0, %v552_v46  ;;  %v633_v38 = vstv %s629_s23  ;;  %s2408_s23 = sld [smem:[#allocation8 + $0x42]] }
 0x132   : > { %v2321_v33 = vld [vmem:[#allocation7 + $0xa] sm:$0xff]  ;;  %2740 = vst [vmem:[#allocation49_spill] sm:$0xff] %v2329_v41  ;;  %v2337_v54 = vld [vmem:[#allocation6 + $0xd] sm:$0xff]  ;;  %v623_v41 = vstv %s2282_s3  ;;  %s2392_s3 = sld [smem:[#allocation8 + $0x11]] }
 0x133   : > { %2736 = vst [vmem:[#allocation45_spill] sm:$0xff] %v2321_v33  ;;  %v2327_v17 = vld [vmem:[#allocation7 + $0xb] sm:$0xff]  ;;  %2742 = vst [vmem:[#allocation51_spill] sm:$0xff] %v2337_v54  ;;  %v591_v33 = vmul.f32 %v589_v31, %v2021_v22  ;;  %v601_v31 = vmul.f32 %v599_v15, %v2115_v62  ;;  %v609_v48 = vadd.f32 %v607_v20, %v602_v7  ;;  %v650_v7 = vstv %s646_s6 }
 0x134   : > { %2739 = vst [vmem:[#allocation48_spill] sm:$0xff] %v2327_v17  ;;  %v2331_v35 = vld [vmem:[#allocation7 + $0x4] sm:$0xff]  ;;  %v2333_v34 = vld [vmem:[#allocation7 + $0xc] sm:$0xff]  ;;  %v624_v15 = vmul.f32 %v623_v41, %v2138_v39  ;;  %v625_v11 = vmul.f32 %v623_v41, %v2140_v13 }
 0x135   : > { %2741 = vst [vmem:[#allocation50_spill] sm:$0xff] %v2333_v34  ;;  %v2335_v59 = vld [vmem:[#allocation6 + $0x5] sm:$0xff]  ;;  %v2341_v40 = vld [vmem:[#allocation7 + $0x5] sm:$0xff]  ;;  %v2350_v34 = vld [vmem:[#allocation6 + $0xe] sm:$0xff]  ;;  %v593_v22 = vadd.f32 %v591_v33, %v586_v61  ;;  %v619_v62 = vadd.f32 %v617_v21, %v609_v48  ;;  %v640_v61 = vstv %s2296_s17  ;;  %v657_v21 = vstv %s2348_s28  ;;  %s2402_s17 = sld [smem:[#allocation8 + $0x18]]  ;;  %s2414_s28 = sld [smem:[#allocation8 + $0x1f]] }
 0x136   : > { %v2343_v14 = vld [vmem:[#allocation7 + $0xd] sm:$0xff]  ;;  %1112 = vst [vmem:[#allocation6 + $0x10] sm:$0xff] %v1109_v25  ;;  %v634_v25 = vmul.f32 %v633_v38, %v2096_v30  ;;  %v641_v39 = vmul.f32 %v640_v61, %v2142_v3  ;;  %v651_v30 = vmul.f32 %v650_v7, %v2101_v16  ;;  %v667_v48 = vstv %s663_s18  ;;  %s2428_s18 = sld [smem:[#allocation8 + $0x2d]] }
 0x137   : > { %v2345_v17 = vld [vmem:[#allocation6 + $0x6] sm:$0xff]  ;;  %v2352_v54 = vld [vmem:[#allocation7 + $0x6] sm:$0xff]  ;;  %v603_v0 = vadd.f32 %v601_v31, %v593_v22  ;;  %v626_v20 = vadd.f32 %v624_v15, %v619_v62  ;;  %v642_v41 = vmul.f32 %v640_v61, %v2144_v2  ;;  %v668_v16 = vmul.f32 %v667_v48, %v2103_v52 }
 0x138   : > { %v2354_v46 = vld [vmem:[#allocation7 + $0xe] sm:$0xff]  ;;  %1110 = vst [vmem:[#allocation6] sm:$0xff] %v2272_v23  ;;  %1111 = vst [vmem:[#allocation6 + $0x8] sm:$0xff] %v2262_v49  ;;  %v701_v15 = vstv %s697_s22  ;;  %v659_v61 = vmul.f32 %v657_v21, %v2151_v24  ;;  %v691_v52 = vstv %s2382_s19  ;;  %v718_v24 = vstv %s714_s16  ;;  %s731_s27 = smul.f32 0.25, %s2392_s3  ;;  %s2431_s19 = sld [smem:[#allocation8 + $0x57]] }
 0x139   : > { %1122 = vst [vmem:[#allocation7] sm:$0xff] %v2284_v12  ;;  %1123 = vst [vmem:[#allocation7 + $0x8] sm:$0xff] %v2286_v47  ;;  %v610_v33 = vadd.f32 %v608_v45, %v603_v0  ;;  %v636_v22 = vadd.f32 %v634_v25, %v626_v20  ;;  %v658_v0 = vmul.f32 %v657_v21, %v2149_v42  ;;  %v674_v45 = vstv %s2372_s26  ;;  %v2744_v20 = vld [vmem:[#allocation23_spill] sm:$0xff]  ;;  %v716_v21 = vld [vmem:[#allocation4 + $0x1] sm:$0xff]  ;;  %s2425_s26 = sld [smem:[#allocation8 + $0x50]]  ;;  %s782_s22 = smul.f32 0.25, %s2422_s8 }
 0x13a   : > { %1124 = vst [vmem:[#allocation7 + $0x10] sm:$0xff] %v1121_v19  ;;  %v618_v19 = vmul.f32 %v616_v60, %v2117_v29  ;;  %v635_v29 = vmul.f32 %v633_v38, %v2119_v63  ;;  %v652_v63 = vmul.f32 %v650_v7, %v2125_v5  ;;  %v684_v25 = vstv %s680_s29  ;;  %s2437_s29 = sld [smem:[#allocation8 + $0x4]]  ;;  %s2443_s16 = sld [smem:[#allocation8 + $0x35]] }
 0x13b   : > { %v643_v31 = vadd.f32 %v641_v39, %v636_v22  ;;  %v669_v7 = vmul.f32 %v667_v48, %v2744_v20  ;;  %v708_v22 = vstv %s2387_s24  ;;  %v2745_v39 = vld [vmem:[#allocation17_spill] sm:$0xff]  ;;  %v1579_v48 = vld [vmem:[#allocation5] sm:$0xff]  ;;  %s748_s6 = smul.f32 0.25, %s2402_s17  ;;  %s2435_s24 = sld [smem:[#allocation8 + $0x5e]] }
 0x13c   : > { %v620_v10 = vadd.f32 %v618_v19, %v610_v33  ;;  %v675_v19 = vmul.f32 %v674_v45, %v2153_v51  ;;  %v2743_v33 = vld [vmem:[#allocation20_spill] sm:$0xff]  ;;  %v676_v51 = vmul.f32 %v674_v45, %v2158_v53  ;;  %v1581_v20 = vld [vmem:[#allocation5 + $0x8] sm:$0xff]  ;;  %s765_s15 = smul.f32 0.25, %s2414_s28 }
 0x13d   : > { %v653_v3 = vadd.f32 %v651_v30, %v643_v31  ;;  %v685_v5 = vmul.f32 %v684_v25, %v2743_v33  ;;  %v702_v30 = vmul.f32 %v701_v15, %v2745_v39  ;;  %v692_v31 = vmul.f32 %v691_v52, %v2160_v4  ;;  %v2747_v4 = vld [vmem:[#allocation25_spill] sm:$0xff]  ;;  %s799_s3 = smul.f32 0.25, %s2428_s18 }
 0x13e   : > { %v627_v60 = vadd.f32 %v625_v11, %v620_v10  ;;  %v735_v33 = vstv %s731_s27  ;;  %v740_v39 = vld [vmem:[#allocation5 + $0x2] sm:$0xff]  ;;  %s2449_s27 = sld [smem:[#allocation8 + $0x3c]] }
 0x13f   : > { %v660_v62 = vadd.f32 %v658_v0, %v653_v3 }
 0x140   : > { %v637_v13 = vadd.f32 %v635_v29, %v627_v60  ;;  %s840_s17 = smul.f32 0.25, %s2437_s29  ;;  %s2478_s29 = sld [smem:[#allocation8 + $0x2e]] }
 0x141   : > { %v670_v42 = vadd.f32 %v668_v16, %v660_v62  ;;  %v719_v62 = vmul.f32 %v718_v24, %v716_v21  ;;  %v742_v21 = vstv %s2408_s23  ;;  %s2447_s23 = sld [smem:[#allocation8 + $0x12]] }
 0x142   : > { %v644_v38 = vadd.f32 %v642_v41, %v637_v13  ;;  %v709_v13 = vmul.f32 %v1579_v48, %v708_v22  ;;  %v2746_v41 = vld [vmem:[#allocation24_spill] sm:$0xff]  ;;  %v734_v48 = vld [vmem:[#allocation4 + $0xa] sm:$0xff] }
 0x143   : > { %v677_v11 = vadd.f32 %v675_v19, %v670_v42  ;;  %v686_v3 = vmul.f32 %v684_v25, %v2746_v41  ;;  %v733_v19 = vld [vmem:[#allocation4 + $0x2] sm:$0xff] }
 0x144   : > { %v654_v2 = vadd.f32 %v652_v63, %v644_v38  ;;  %v723_v63 = vld [vmem:[#allocation5 + $0x1] sm:$0xff]  ;;  %v725_v38 = vstv %s2397_s5  ;;  %s2441_s5 = sld [smem:[#allocation8 + $0xb]] }
 0x145   : > { %v687_v60 = vadd.f32 %v685_v5, %v677_v11  ;;  %v717_v5 = vld [vmem:[#allocation4 + $0x9] sm:$0xff]  ;;  %v726_v25 = vmul.f32 %v725_v38, %v723_v63 }
 0x146   : > { %v661_v10 = vadd.f32 %v659_v61, %v654_v2  ;;  %v1580_v2 = vld [vmem:[#allocation4 + $0x8] sm:$0xff]  ;;  %v693_v61 = vmul.f32 %v691_v52, %v2747_v4  ;;  %v720_v52 = vmul.f32 %v718_v24, %v717_v5 }
 0x147   : > { %v694_v16 = vadd.f32 %v692_v31, %v687_v60  ;;  %v703_v53 = vmul.f32 %v1580_v2, %v701_v15  ;;  %v736_v15 = vmul.f32 %v735_v33, %v733_v19  ;;  %v750_v60 = vld [vmem:[#allocation4 + $0x3] sm:$0xff]  ;;  %v752_v31 = vstv %s748_s6  ;;  %s2455_s6 = sld [smem:[#allocation8 + $0x43]]  ;;  %s874_s8 = smul.f32 0.25, %s2447_s23 }
 0x148   : > { %v671_v29 = vadd.f32 %v669_v7, %v661_v10  ;;  %v710_v7 = vmul.f32 %v1581_v20, %v708_v22  ;;  %v743_v22 = vmul.f32 %v742_v21, %v740_v39  ;;  %v741_v63 = vld [vmem:[#allocation5 + $0xa] sm:$0xff]  ;;  %v753_v24 = vmul.f32 %v752_v31, %v750_v60  ;;  %s942_s23 = smul.f32 0.25, %s2478_s29 }
 0x149   : > { %v704_v42 = vadd.f32 %v702_v30, %v694_v16  ;;  %v759_v16 = vstv %s2418_s30  ;;  %v737_v2 = vmul.f32 %v735_v33, %v734_v48  ;;  %v767_v4 = vld [vmem:[#allocation4 + $0x4] sm:$0xff]  ;;  %v744_v19 = vmul.f32 %v742_v21, %v741_v63  ;;  %v774_v20 = vld [vmem:[#allocation5 + $0x4] sm:$0xff]  ;;  %v785_v63 = vld [vmem:[#allocation4 + $0xd] sm:$0xff]  ;;  %s2452_s30 = sld [smem:[#allocation8 + $0x19]] }
 0x14a   : > { %v678_v0 = vadd.f32 %v676_v51, %v671_v29  ;;  %v724_v29 = vld [vmem:[#allocation5 + $0x9] sm:$0xff]  ;;  %s857_s28 = smul.f32 0.25, %s2441_s5 }
 0x14b   : > { %v711_v11 = vadd.f32 %v709_v13, %v704_v42  ;;  %v727_v41 = vmul.f32 %v725_v38, %v724_v29  ;;  %v768_v29 = vld [vmem:[#allocation4 + $0xc] sm:$0xff]  ;;  %v775_v48 = vld [vmem:[#allocation5 + $0xc] sm:$0xff] }
 0x14c   : > { %v688_v45 = vadd.f32 %v686_v3, %v678_v0  ;;  %v757_v0 = vld [vmem:[#allocation5 + $0x3] sm:$0xff] }
 0x14d   : > { %v721_v51 = vadd.f32 %v719_v62, %v711_v11  ;;  %v760_v42 = vmul.f32 %v759_v16, %v757_v0 }
 0x14e   : > { %v695_v10 = vadd.f32 %v693_v61, %v688_v45  ;;  %v751_v45 = vld [vmem:[#allocation4 + $0xb] sm:$0xff]  ;;  %v769_v61 = vstv %s765_s15  ;;  %s2463_s15 = sld [smem:[#allocation8 + $0x4a]] }
 0x14f   : > { %v728_v3 = vadd.f32 %v726_v25, %v721_v51  ;;  %v758_v25 = vld [vmem:[#allocation5 + $0xb] sm:$0xff]  ;;  %v754_v33 = vmul.f32 %v752_v31, %v751_v45  ;;  %s891_s18 = smul.f32 0.25, %s2452_s30 }
 0x150   : > { %v705_v30 = vadd.f32 %v703_v53, %v695_v10  ;;  %v770_v10 = vmul.f32 %v769_v61, %v767_v4  ;;  %v792_v4 = vld [vmem:[#allocation5 + $0xd] sm:$0xff] }
 0x151   : > { %v738_v53 = vadd.f32 %v736_v15, %v728_v3  ;;  %v784_v15 = vld [vmem:[#allocation4 + $0x5] sm:$0xff] }
 0x152   : > { %v712_v13 = vadd.f32 %v710_v7, %v705_v30  ;;  %v776_v7 = vstv %s2425_s26  ;;  %v761_v30 = vmul.f32 %v759_v16, %v758_v25  ;;  %s2459_s26 = sld [smem:[#allocation8 + $0x20]] }
 0x153   : > { %v745_v5 = vadd.f32 %v743_v22, %v738_v53  ;;  %v777_v21 = vmul.f32 %v776_v7, %v774_v20  ;;  %v791_v22 = vld [vmem:[#allocation5 + $0x5] sm:$0xff]  ;;  %v778_v16 = vmul.f32 %v776_v7, %v775_v48  ;;  %v802_v20 = vld [vmem:[#allocation4 + $0xe] sm:$0xff] }
 0x154   : > { %v722_v62 = vadd.f32 %v720_v52, %v712_v13  ;;  %v786_v52 = vstv %s782_s22  ;;  %v771_v13 = vmul.f32 %v769_v61, %v768_v29  ;;  %v844_v29 = vstv %s840_s17  ;;  %s2473_s22 = sld [smem:[#allocation8 + $0x51]]  ;;  %s2493_s17 = sld [smem:[#allocation8 + $0x5f]] }
 0x155   : > { %v755_v39 = vadd.f32 %v753_v24, %v745_v5  ;;  %v787_v31 = vmul.f32 %v786_v52, %v784_v15  ;;  %v801_v24 = vld [vmem:[#allocation4 + $0x6] sm:$0xff]  ;;  %v788_v61 = vmul.f32 %v786_v52, %v785_v63 }
 0x156   : > { %v729_v38 = vadd.f32 %v727_v41, %v722_v62  ;;  %v793_v41 = vstv %s2431_s19  ;;  %s2468_s19 = sld [smem:[#allocation8 + $0x27]] }
 0x157   : > { %v762_v60 = vadd.f32 %v760_v42, %v755_v39  ;;  %v794_v62 = vmul.f32 %v793_v41, %v791_v22  ;;  %v808_v42 = vld [vmem:[#allocation5 + $0x6] sm:$0xff]  ;;  %v809_v39 = vld [vmem:[#allocation5 + $0xe] sm:$0xff]  ;;  %v2748_v22 = vld [vmem:[#allocation19_spill] sm:$0xff] }
 0x158   : > { %v739_v11 = vadd.f32 %v737_v2, %v729_v38  ;;  %v803_v2 = vstv %s799_s3  ;;  %s2483_s3 = sld [smem:[#allocation8 + $0x58]] }
 0x159   : > { %v772_v0 = vadd.f32 %v770_v10, %v762_v60  ;;  %v804_v38 = vmul.f32 %v803_v2, %v801_v24  ;;  %v805_v15 = vmul.f32 %v803_v2, %v802_v20  ;;  %v868_v24 = vstv %s2449_s27  ;;  %s2498_s27 = sld [smem:[#allocation8 + $0xc]] }
 0x15a   : > { %v746_v51 = vadd.f32 %v744_v19, %v739_v11  ;;  %v810_v19 = vstv %s2435_s24  ;;  %s908_s24 = smul.f32 0.25, %s2459_s26 }
 0x15b   : > { %v779_v45 = vadd.f32 %v777_v21, %v772_v0  ;;  %v811_v7 = vmul.f32 %v810_v19, %v808_v42  ;;  %v851_v21 = vstv %s2443_s16  ;;  %v2749_v0 = vld [vmem:[#allocation22_spill] sm:$0xff]  ;;  %s2488_s16 = sld [smem:[#allocation8 + $0x5]] }
 0x15c   : > { %v756_v3 = vadd.f32 %v754_v33, %v746_v51  ;;  %v795_v33 = vmul.f32 %v793_v41, %v792_v4  ;;  %v812_v51 = vmul.f32 %v810_v19, %v809_v39  ;;  %v845_v41 = vmul.f32 %v844_v29, %v2748_v22  ;;  %v2751_v19 = vld [vmem:[#allocation21_spill] sm:$0xff]  ;;  %s925_s5 = smul.f32 0.25, %s2468_s19 }
 0x15d   : > { %v789_v25 = vadd.f32 %v787_v31, %v779_v45  ;;  %v852_v63 = vmul.f32 %v851_v21, %v2749_v0  ;;  %v878_v4 = vstv %s874_s8  ;;  %v870_v39 = vmul.f32 %v868_v24, %v2220_v8  ;;  %v2754_v8 = vld [vmem:[#allocation35_spill] sm:$0xff]  ;;  %v2756_v0 = vld [vmem:[#allocation36_spill] sm:$0xff]  ;;  %s2513_s8 = sld [smem:[#allocation8 + $0x3d]] }
 0x15e   : > { %v763_v53 = vadd.f32 %v761_v30, %v756_v3 }
 0x15f   : > { %v796_v11 = vadd.f32 %v794_v62, %v789_v25  ;;  %v885_v25 = vstv %s2455_s6  ;;  %s2508_s6 = sld [smem:[#allocation8 + $0x13]]  ;;  %s1000_s26 = smul.f32 0.25, %s2498_s27 }
 0x160   : > { %v773_v5 = vadd.f32 %v771_v13, %v763_v53  ;;  %v861_v13 = vstv %s857_s28  ;;  %v887_v22 = vmul.f32 %v885_v25, %v2754_v8  ;;  %s2503_s28 = sld [smem:[#allocation8 + $0x36]] }
 0x161   : > { %v806_v30 = vadd.f32 %v804_v38, %v796_v11  ;;  %v862_v45 = vmul.f32 %v861_v13, %v2184_v1  ;;  %v879_v1 = vmul.f32 %v878_v4, %v2186_v28  ;;  %s983_s30 = smul.f32 0.25, %s2488_s16 }
 0x162   : > { %v780_v10 = vadd.f32 %v778_v16, %v773_v5  ;;  %v2750_v16 = vld [vmem:[#allocation18_spill] sm:$0xff]  ;;  %v869_v5 = vmul.f32 %v868_v24, %v2218_v26  ;;  %v886_v26 = vmul.f32 %v885_v25, %v2224_v36  ;;  %v2755_v36 = vld [vmem:[#allocation37_spill] sm:$0xff]  ;;  %v2760_v25 = vld [vmem:[#allocation39_spill] sm:$0xff] }
 0x163   : > { %v813_v48 = vadd.f32 %v811_v7, %v806_v30  ;;  %v846_v62 = vmul.f32 %v844_v29, %v2750_v16 }
 0x164   : > { %v790_v52 = vadd.f32 %v788_v61, %v780_v10  ;;  %v853_v61 = vmul.f32 %v851_v21, %v2751_v19  ;;  %v895_v10 = vstv %s891_s18  ;;  %v2759_v19 = vld [vmem:[#allocation40_spill] sm:$0xff]  ;;  %s2523_s18 = sld [smem:[#allocation8 + $0x44]] }
 0x165   : > { %v847_v3 = vadd.f32 %v845_v41, %v813_v48  ;;  %s1017_s19 = smul.f32 0.25, %s2508_s6 }
 0x166   : > { %v797_v60 = vadd.f32 %v795_v33, %v790_v52  ;;  %v863_v33 = vmul.f32 %v861_v13, %v2216_v55  ;;  %v2752_v55 = vld [vmem:[#allocation34_spill] sm:$0xff] }
 0x167   : > { %v854_v53 = vadd.f32 %v852_v63, %v847_v3  ;;  %v880_v30 = vmul.f32 %v878_v4, %v2752_v55  ;;  %v897_v63 = vmul.f32 %v895_v10, %v2756_v0  ;;  %v2765_v0 = vld [vmem:[#allocation27_spill] sm:$0xff] }
 0x168   : > { %v807_v31 = vadd.f32 %v805_v15, %v797_v60  ;;  %v902_v15 = vstv %s2463_s15  ;;  %v912_v60 = vstv %s908_s24  ;;  %s2518_s15 = sld [smem:[#allocation8 + $0x1a]]  ;;  %s2533_s24 = sld [smem:[#allocation8 + $0x4b]] }
 0x169   : > { %v864_v38 = vadd.f32 %v862_v45, %v854_v53  ;;  %v903_v13 = vmul.f32 %v902_v15, %v2755_v36  ;;  %v2758_v45 = vld [vmem:[#allocation38_spill] sm:$0xff]  ;;  %v994_v36 = vstv %s2503_s28  ;;  %s2558_s28 = sld [smem:[#allocation8 + $0x6]] }
 0x16a   : > { %v814_v2 = vadd.f32 %v812_v51, %v807_v31  ;;  %v2753_v51 = vld [vmem:[#allocation28_spill] sm:$0xff]  ;;  %v919_v31 = vstv %s2473_s22  ;;  %v904_v4 = vmul.f32 %v902_v15, %v2758_v45  ;;  %s2528_s22 = sld [smem:[#allocation8 + $0x21]] }
 0x16b   : > { %v871_v7 = vadd.f32 %v869_v5, %v864_v38  ;;  %v896_v28 = vmul.f32 %v895_v10, %v2753_v51  ;;  %v936_v38 = vstv %s2483_s3  ;;  %v946_v10 = vstv %s942_s23  ;;  %s2538_s3 = sld [smem:[#allocation8 + $0x28]]  ;;  %s2553_s23 = sld [smem:[#allocation8 + $0x59]] }
 0x16c   : > { %v848_v42 = vadd.f32 %v846_v62, %v814_v2  ;;  %v2757_v2 = vld [vmem:[#allocation30_spill] sm:$0xff]  ;;  %v929_v62 = vstv %s925_s5  ;;  %v937_v15 = vmul.f32 %v936_v38, %v2245_v37  ;;  %s2543_s5 = sld [smem:[#allocation8 + $0x52]] }
 0x16d   : > { %v881_v29 = vadd.f32 %v879_v1, %v871_v7  ;;  %v913_v16 = vmul.f32 %v912_v60, %v2757_v2  ;;  %v2761_v7 = vld [vmem:[#allocation31_spill] sm:$0xff] }
 0x16e   : > { %v855_v20 = vadd.f32 %v853_v61, %v848_v42  ;;  %v920_v61 = vmul.f32 %v919_v31, %v2759_v19  ;;  %v930_v1 = vmul.f32 %v929_v62, %v2761_v7  ;;  %s1034_s29 = smul.f32 0.25, %s2518_s15 }
 0x16f   : > { %v888_v21 = vadd.f32 %v886_v26, %v881_v29  ;;  %s1126_s15 = smul.f32 0.25, %s2558_s28 }
 0x170   : > { %v865_v11 = vadd.f32 %v863_v33, %v855_v20  ;;  %v914_v20 = vmul.f32 %v912_v60, %v2760_v25  ;;  %s1051_s16 = smul.f32 0.25, %s2528_s22 }
 0x171   : > { %v898_v41 = vadd.f32 %v896_v28, %v888_v21  ;;  %v2764_v28 = vld [vmem:[#allocation32_spill] sm:$0xff]  ;;  %s1068_s27 = smul.f32 0.25, %s2538_s3 }
 0x172   : > { %v872_v52 = vadd.f32 %v870_v39, %v865_v11  ;;  %v2762_v39 = vld [vmem:[#allocation41_spill] sm:$0xff]  ;;  %v947_v60 = vmul.f32 %v946_v10, %v2764_v28 }
 0x173   : > { %v905_v24 = vadd.f32 %v903_v13, %v898_v41  ;;  %v921_v29 = vmul.f32 %v919_v31, %v2762_v39  ;;  %v948_v31 = vmul.f32 %v946_v10, %v2251_v32  ;;  %v2767_v32 = vld [vmem:[#allocation26_spill] sm:$0xff] }
 0x174   : > { %v882_v48 = vadd.f32 %v880_v30, %v872_v52  ;;  %v953_v52 = vstv %s2493_s17  ;;  %v2763_v30 = vld [vmem:[#allocation42_spill] sm:$0xff]  ;;  %s2548_s17 = sld [smem:[#allocation8 + $0x2f]] }
 0x175   : > { %v915_v42 = vadd.f32 %v913_v16, %v905_v24  ;;  %v931_v21 = vmul.f32 %v929_v62, %v2763_v30  ;;  %v954_v37 = vmul.f32 %v953_v52, %v2253_v50  ;;  %v1004_v24 = vstv %s1000_s26  ;;  %v2766_v50 = vld [vmem:[#allocation33_spill] sm:$0xff]  ;;  %v2769_v30 = vld [vmem:[#allocation43_spill] sm:$0xff]  ;;  %s2573_s26 = sld [smem:[#allocation8 + $0x37]] }
 0x176   : > { %v889_v3 = vadd.f32 %v887_v22, %v882_v48  ;;  %v987_v48 = vstv %s983_s30  ;;  %v938_v22 = vmul.f32 %v936_v38, %v2247_v9  ;;  %v955_v9 = vmul.f32 %v953_v52, %v2255_v27  ;;  %v2768_v27 = vld [vmem:[#allocation29_spill] sm:$0xff]  ;;  %s2563_s30 = sld [smem:[#allocation8 + $0x60]] }
 0x177   : > { %v922_v33 = vadd.f32 %v920_v61, %v915_v42  ;;  %v995_v62 = vmul.f32 %v994_v36, %v2766_v50  ;;  %v1005_v19 = vmul.f32 %v1004_v24, %v2300_v56  ;;  %v1021_v61 = vstv %s1017_s19  ;;  %v2775_v50 = vld [vmem:[#allocation49_spill] sm:$0xff]  ;;  %s2583_s19 = sld [smem:[#allocation8 + $0x3e]] }
 0x178   : > { %v899_v53 = vadd.f32 %v897_v63, %v889_v3  ;;  %v988_v63 = vmul.f32 %v987_v48, %v2765_v0  ;;  %v1022_v56 = vmul.f32 %v1021_v61, %v2302_v43  ;;  %v2774_v0 = vld [vmem:[#allocation48_spill] sm:$0xff] }
 0x179   : > { %v932_v26 = vadd.f32 %v930_v1, %v922_v33  ;;  %v1028_v33 = vstv %s2523_s18  ;;  %v1006_v1 = vmul.f32 %v1004_v24, %v2311_v57  ;;  %v1023_v57 = vmul.f32 %v1021_v61, %v2317_v58  ;;  %v2772_v58 = vld [vmem:[#allocation46_spill] sm:$0xff]  ;;  %s2578_s18 = sld [smem:[#allocation8 + $0x14]] }
 0x17a   : > { %v906_v5 = vadd.f32 %v904_v4, %v899_v53  ;;  %v1011_v53 = vstv %s2513_s8  ;;  %v989_v4 = vmul.f32 %v987_v48, %v2767_v32  ;;  %s1085_s6 = smul.f32 0.25, %s2548_s17  ;;  %s2568_s8 = sld [smem:[#allocation8 + $0xd]] }
 0x17b   : > { %v939_v51 = vadd.f32 %v937_v15, %v932_v26  ;;  %v1045_v15 = vstv %s2533_s24  ;;  %s2588_s24 = sld [smem:[#allocation8 + $0x1b]] }
 0x17c   : > { %v916_v11 = vadd.f32 %v914_v20, %v906_v5  ;;  %v996_v5 = vmul.f32 %v994_v36, %v2768_v27  ;;  %v1012_v20 = vmul.f32 %v1011_v53, %v2313_v44  ;;  %v1029_v44 = vmul.f32 %v1028_v33, %v2319_v18  ;;  %v2771_v18 = vld [vmem:[#allocation47_spill] sm:$0xff]  ;;  %v2773_v36 = vld [vmem:[#allocation44_spill] sm:$0xff] }
 0x17d   : > { %v949_v41 = vadd.f32 %v947_v60, %v939_v51  ;;  %v1046_v48 = vmul.f32 %v1045_v15, %v2771_v18  ;;  %v1089_v32 = vstv %s1085_s6  ;;  %v1153_v18 = vld [vmem:[#allocation7 + $0x9] sm:$0xff]  ;;  %s2617_s6 = sld [smem:[#allocation8 + $0x5a]] }
 0x17e   : > { %v923_v55 = vadd.f32 %v921_v29, %v916_v11  ;;  %v1038_v11 = vstv %s1034_s29  ;;  %v1013_v29 = vmul.f32 %v1011_v53, %v2315_v6  ;;  %v2770_v6 = vld [vmem:[#allocation45_spill] sm:$0xff]  ;;  %s2593_s29 = sld [smem:[#allocation8 + $0x45]] }
 0x17f   : > { %v956_v3 = vadd.f32 %v954_v37, %v949_v41  ;;  %v1039_v43 = vmul.f32 %v1038_v11, %v2769_v30  ;;  %v1030_v28 = vmul.f32 %v1028_v33, %v2770_v6  ;;  %v1040_v41 = vmul.f32 %v1038_v11, %v2772_v58  ;;  %s1160_s3 = smul.f32 0.25, %s2578_s18  ;;  %s1379_s18 = sshll.u32 %s1881_s7, 4 }
 0x180   : > { %v933_v8 = vadd.f32 %v931_v21, %v923_v55  ;;  %v1055_v21 = vstv %s1051_s16  ;;  %v1130_v33 = vstv %s1126_s15  ;;  %s1143_s22 = smul.f32 0.25, %s2568_s8  ;;  %s2603_s16 = sld [smem:[#allocation8 + $0x4c]] }
 0x181   : > { %v990_v16 = vadd.f32 %v988_v63, %v956_v3  ;;  %v1047_v63 = vmul.f32 %v1045_v15, %v2774_v0  ;;  %v1164_v6 = vstv %s1160_s3  ;;  %s1177_s17 = smul.f32 0.25, %s2588_s24 }
 0x182   : > { %v940_v13 = vadd.f32 %v938_v22, %v933_v8  ;;  %v1062_v8 = vstv %s2543_s5  ;;  %s2598_s5 = sld [smem:[#allocation8 + $0x22]] }
 0x183   : > { %v997_v42 = vadd.f32 %v995_v62, %v990_v16  ;;  %v1057_v62 = vmul.f32 %v1055_v21, %v2775_v50 }
 0x184   : > { %v950_v2 = vadd.f32 %v948_v31, %v940_v13  ;;  %v1056_v13 = vmul.f32 %v1055_v21, %v2773_v36  ;;  %v1072_v31 = vstv %s1068_s27  ;;  %v1146_v21 = vld [vmem:[#allocation6 + $0x9] sm:$0xff]  ;;  %s2611_s27 = sld [smem:[#allocation8 + $0x53]] }
 0x185   : > { %v1007_v25 = vadd.f32 %v1005_v19, %v997_v42  ;;  %v2776_v42 = vld [vmem:[#allocation50_spill] sm:$0xff]  ;;  %v1179_v36 = vld [vmem:[#allocation6 + $0x3] sm:$0xff] }
 0x186   : > { %v957_v45 = vadd.f32 %v955_v9, %v950_v2  ;;  %v1063_v2 = vmul.f32 %v1062_v8, %v2331_v35  ;;  %v1079_v9 = vstv %s2553_s23  ;;  %v1064_v19 = vmul.f32 %v1062_v8, %v2776_v42  ;;  %s2607_s23 = sld [smem:[#allocation8 + $0x29]] }
 0x187   : > { %v1014_v10 = vadd.f32 %v1012_v20, %v1007_v25  ;;  %v1080_v35 = vmul.f32 %v1079_v9, %v2341_v40  ;;  %v1171_v8 = vstv %s2593_s29 }
 0x188   : > { %v991_v38 = vadd.f32 %v989_v4, %v957_v45  ;;  %v1073_v45 = vmul.f32 %v1072_v31, %v2335_v59  ;;  %v1090_v59 = vmul.f32 %v1089_v32, %v2345_v17  ;;  %v1131_v17 = vmul.f32 %v1130_v33, %v2272_v23  ;;  %s1194_s28 = smul.f32 0.25, %s2598_s5 }
 0x189   : > { %v1024_v26 = vadd.f32 %v1022_v56, %v1014_v10  ;;  %v1137_v56 = vstv %s2573_s26  ;;  %v1132_v23 = vmul.f32 %v1130_v33, %v2262_v49  ;;  %s2621_s26 = sld [smem:[#allocation8 + $0x61]]  ;;  %v1197_v33 = vld [vmem:[#allocation6 + $0xc] sm:$0xff] }
 0x18a   : > { %v998_v7 = vadd.f32 %v996_v5, %v991_v38  ;;  %v1096_v38 = vstv %s2563_s30  ;;  %v2777_v5 = vld [vmem:[#allocation51_spill] sm:$0xff]  ;;  %s2614_s30 = sld [smem:[#allocation8 + $0x30]] }
 0x18b   : > { %v1031_v55 = vadd.f32 %v1029_v44, %v1024_v26  ;;  %v1074_v25 = vmul.f32 %v1072_v31, %v2777_v5  ;;  %v1097_v40 = vmul.f32 %v1096_v38, %v2352_v54  ;;  %v1145_v26 = vld [vmem:[#allocation6 + $0x1] sm:$0xff]  ;;  %v1147_v44 = vstv %s1143_s22  ;;  %s190_s22 = scalar_lea.vmem [#allocation13], %s1379_s18 }
 0x18c   : > { %v1008_v39 = vadd.f32 %v1006_v1, %v998_v7  ;;  %v1081_v1 = vmul.f32 %v1079_v9, %v2343_v14  ;;  %v1098_v15 = vmul.f32 %v1096_v38, %v2354_v46  ;;  %s1211_s8 = smul.f32 0.25, %s2607_s23  ;;  %v1203_v38 = vld [vmem:[#allocation7 + $0x4] sm:$0xff]  ;;  %s1272_s24 = sshll.u32 %s190_s22, 4  ;;  %s2634_s24 = int_to_ptr.vmem [resolvable:$true] %s1272_s24 }
 0x18d   : > { %v1041_v60 = vadd.f32 %v1039_v43, %v1031_v55  ;;  %v1154_v55 = vstv %s2583_s19  ;;  %v1148_v43 = vmul.f32 %v1147_v44, %v1145_v26  ;;  %s1485_s19 = sshll.u32 %s1703_s12, 8  ;;  %s1625_s12 = scalar_lea.vmem %s2634_s24, 256 }
 0x18e   : > { %v1015_v52 = vadd.f32 %v1013_v29, %v1008_v39  ;;  %v1091_v39 = vmul.f32 %v1089_v32, %v2350_v34  ;;  %v1156_v31 = vmul.f32 %v1154_v55, %v1153_v18  ;;  %v1198_v32 = vstv %s1194_s28  ;;  %s2632_s5 = scalar_lea.hbm %s2686_s2, %s1485_s19  ;;  %p1626_p8 = scmp.ne.s32.totalorder %s2634_s24, %s1625_s12 }
 0x18f   : > { %v1048_v37 = vadd.f32 %v1046_v48, %v1041_v60  ;;  %v1169_v48 = vld [vmem:[#allocation7 + $0x2] sm:$0xff] }
 0x190   : > { %v1025_v51 = vadd.f32 %v1023_v57, %v1015_v52  ;;  %v1138_v52 = vmul.f32 %v1137_v56, %v2284_v12  ;;  %v1152_v57 = vld [vmem:[#allocation7 + $0x1] sm:$0xff]  ;;  %v1139_v12 = vmul.f32 %v1137_v56, %v2286_v47  ;;  %v1172_v0 = vmul.f32 %v1171_v8, %v1169_v48  ;;  %s1228_s15 = smul.f32 0.25, %s2614_s30  ;;  %p1627_p0 = pnand %p1626_p8, %p2778_p13 }
 0x191   : > { %v1058_v24 = vadd.f32 %v1056_v13, %v1048_v37  ;;  %v1155_v60 = vmul.f32 %v1154_v55, %v1152_v57  ;;  %v1163_v37 = vld [vmem:[#allocation6 + $0xa] sm:$0xff]  ;;  %v1181_v13 = vstv %s1177_s17  ;;  %s1725_s17 = smov [#allocation13]  }
 0x192   : > { %v1032_v22 = vadd.f32 %v1030_v28, %v1025_v51  ;;  %v1162_v51 = vld [vmem:[#allocation6 + $0x2] sm:$0xff]  ;;  %v1232_v57 = vstv %s1228_s15  ;;  %p1628_p2 = pneg %p1627_p0  ;;  %s1629_s23 = sshll.u32 %s1725_s17, 4  ;;  %s1630_s23 = int_to_ptr.vmem [resolvable:$false] %s1629_s23 }
 0x193   : > { %v1065_v53 = vadd.f32 %v1063_v2, %v1058_v24  ;;  %v1186_v24 = vld [vmem:[#allocation7 + $0x3] sm:$0xff]  ;;  %v1188_v2 = vstv %s2603_s16  ;;  %s1259_s16 = scalar_lea.sflag [#allocation10], %s1881_s7  ;;  %p1632_p6 = scmp.lt.s32.totalorder %s2634_s24, %s1630_s23 }
 0x194   : > { %v1042_v3 = vadd.f32 %v1040_v41, %v1032_v22  ;;  %v1149_v22 = vmul.f32 %v1147_v44, %v1146_v21  ;;  %v1165_v41 = vmul.f32 %v1164_v6, %v1162_v51  ;;  %v1200_v44 = vmul.f32 %v1198_v32, %v1197_v33  ;;  %v1237_v21 = vld [vmem:[#allocation7 + $0x6] sm:$0xff] }
 0x195   : > { %v1075_v61 = vadd.f32 %v1073_v45, %v1065_v53  ;;  %v1180_v53 = vld [vmem:[#allocation6 + $0xb] sm:$0xff]  ;;  %v1239_v51 = vstv %s2621_s26 }
 0x196   : > { %v1049_v16 = vadd.f32 %v1047_v63, %v1042_v3  ;;  %v1170_v63 = vld [vmem:[#allocation7 + $0xa] sm:$0xff] }
 0x197   : > { %v1082_v20 = vadd.f32 %v1080_v35, %v1075_v61  ;;  %v1196_v45 = vld [vmem:[#allocation6 + $0x4] sm:$0xff]  ;;  %v1173_v42 = vmul.f32 %v1171_v8, %v1170_v63  ;;  %v1189_v61 = vmul.f32 %v1188_v2, %v1186_v24 }
 0x198   : > { %v1059_v4 = vadd.f32 %v1057_v62, %v1049_v16  ;;  %v1166_v16 = vmul.f32 %v1164_v6, %v1163_v37  ;;  %v1182_v62 = vmul.f32 %v1181_v13, %v1179_v36  ;;  %v1187_v35 = vld [vmem:[#allocation7 + $0xb] sm:$0xff] }
 0x199   : > { %v1092_v10 = vadd.f32 %v1090_v59, %v1082_v20  ;;  %v1199_v59 = vmul.f32 %v1198_v32, %v1196_v45 }
 0x19a   : > { %v1066_v27 = vadd.f32 %v1064_v19, %v1059_v4 }
 0x19b   : > { %v1099_v29 = vadd.f32 %v1097_v40, %v1092_v10  ;;  %v1190_v40 = vmul.f32 %v1188_v2, %v1187_v35 }
 0x19c   : > { %v1076_v7 = vadd.f32 %v1074_v25, %v1066_v27  ;;  %v1205_v27 = vstv %s2611_s27  ;;  %v1183_v25 = vmul.f32 %v1181_v13, %v1180_v53  ;;  %s1631_s27 = scalar_lea.vmem %s1630_s23, 512 }
 0x19d   : > { %v1133_v54 = vadd.f32 %v1131_v17, %v1099_v29  ;;  %v1220_v29 = vld [vmem:[#allocation7 + $0x5] sm:$0xff]  ;;  %v1222_v17 = vstv %s2617_s6  ;;  %p1633_p1 = scmp.lt.s32.totalorder %s1631_s27, %s1625_s12 }
 0x19e   : > { %v1083_v11 = vadd.f32 %v1081_v1, %v1076_v7  ;;  %v1213_v7 = vld [vmem:[#allocation6 + $0x5] sm:$0xff]  ;;  %v1215_v1 = vstv %s1211_s8 }
 0x19f   : > { %v1140_v30 = vadd.f32 %v1138_v52, %v1133_v54  ;;  %v1214_v54 = vld [vmem:[#allocation6 + $0xd] sm:$0xff]  ;;  %p1634_p7 = por %p1633_p1, %p1632_p6 }
 0x1a0   : > { %v1093_v14 = vadd.f32 %v1091_v39, %v1083_v11  ;;  %v1206_v11 = vmul.f32 %v1205_v27, %v1203_v38  ;;  %v1204_v39 = vld [vmem:[#allocation7 + $0xc] sm:$0xff] }
 0x1a1   : > { %v1150_v28 = vadd.f32 %v1148_v43, %v1140_v30  ;;  %v1230_v52 = vld [vmem:[#allocation6 + $0x6] sm:$0xff]  ;;  %v1223_v30 = vmul.f32 %v1222_v17, %v1220_v29  ;;  %p1635_p12 = pnand %p1634_p7, %p1628_p2 }
 0x1a2   : > { %v1100_v34 = vadd.f32 %v1098_v15, %v1093_v14  ;;  %v1216_v15 = vmul.f32 %v1215_v1, %v1213_v7  ;;  %v1221_v43 = vld [vmem:[#allocation7 + $0xd] sm:$0xff] }
 0x1a3   : > { %v1157_v58 = vadd.f32 %v1155_v60, %v1150_v28  ;;  %v1233_v28 = vmul.f32 %v1232_v57, %v1230_v52  ;;  %v1231_v60 = vld [vmem:[#allocation6 + $0xe] sm:$0xff]  ;;  %v1224_v48 = vmul.f32 %v1222_v17, %v1221_v43 }
 0x1a4   : > { %v1134_v46 = vadd.f32 %v1132_v23, %v1100_v34  ;;  %v1207_v34 = vmul.f32 %v1205_v27, %v1204_v39 }
 0x1a5   : > { %v1167_v3 = vadd.f32 %v1165_v41, %v1157_v58  ;;  %v1234_v41 = vmul.f32 %v1232_v57, %v1231_v60 }
 0x1a6   : > { %v1141_v49 = vadd.f32 %v1139_v12, %v1134_v46  ;;  %v1217_v46 = vmul.f32 %v1215_v1, %v1214_v54 }
 0x1a7   : > { %v1174_v50 = vadd.f32 %v1172_v0, %v1167_v3 }
 0x1a8   : > { %v1151_v47 = vadd.f32 %v1149_v22, %v1141_v49  ;;  %v1240_v49 = vmul.f32 %v1239_v51, %v1237_v21  ;;  %v1238_v22 = vld [vmem:[#allocation7 + $0xe] sm:$0xff] }
 0x1a9   : > { %v1184_v19 = vadd.f32 %v1182_v62, %v1174_v50  ;;  %v1241_v13 = vmul.f32 %v1239_v51, %v1238_v22 }
 0x1aa   : > { %v1158_v9 = vadd.f32 %v1156_v31, %v1151_v47 }
 0x1ab   : > { %v1191_v20 = vadd.f32 %v1189_v61, %v1184_v19 }
 0x1ac   : > { %v1168_v4 = vadd.f32 %v1166_v16, %v1158_v9 }
 0x1ad   : > { %v1201_v56 = vadd.f32 %v1199_v59, %v1191_v20 }
 0x1ae   : > { %v1175_v5 = vadd.f32 %v1173_v42, %v1168_v4 }
 0x1af   : > { %v1208_v14 = vadd.f32 %v1206_v11, %v1201_v56 }
 0x1b0   : > { %v1185_v10 = vadd.f32 %v1183_v25, %v1175_v5 }
 0x1b1   : > { %v1218_v23 = vadd.f32 %v1216_v15, %v1208_v14 }
 0x1b2   : > { %v1192_v26 = vadd.f32 %v1190_v40, %v1185_v10 }
 0x1b3   : > { %v1225_v12 = vadd.f32 %v1223_v30, %v1218_v23 }
 0x1b4   : > { %v1202_v55 = vadd.f32 %v1200_v44, %v1192_v26 }
 0x1b5   : > { %v1235_v8 = vadd.f32 %v1233_v28, %v1225_v12 }
 0x1b6   : > { %v1209_v6 = vadd.f32 %v1207_v34, %v1202_v55 }
 0x1b7   : > { %v1242_v37 = vadd.f32 %v1240_v49, %v1235_v8 }
 0x1b8   : > { %v1219_v18 = vadd.f32 %v1217_v46, %v1209_v6 }
 0x1b9   : > { %v1477_v47 = vmul.f32 -1.442695, %v1242_v37 }
 0x1ba   : > { %v1226_v58 = vadd.f32 %v1224_v48, %v1219_v18 }
 0x1bb   : > { %1571 = vpow2.f32 %v1477_v47 }
 0x1bc   : > { %v1236_v36 = vadd.f32 %v1234_v41, %v1226_v58 }
 0x1be   : > { %v1243_v31 = vadd.f32 %v1241_v13, %v1236_v36 }
 0x1c0   : > { %v1478_v3 = vmul.f32 -1.442695, %v1243_v31 }
 0x1c2   : > { %1573 = vpow2.f32 %v1478_v3 }
 0x1c5   : > { %v1572_v0 = vpop.eup %1571 }
 0x1c6   : > { %v1250_v63 = vadd.f32 1.0, %v1572_v0 }
 0x1c8   : > { %1575 = vrcp.f32 %v1250_v63 }
 0x1cc   : > { %v1574_v24 = vpop.eup %1573 }
 0x1cd   : > { %v1251_v2 = vadd.f32 1.0, %v1574_v24 }
 0x1cf   : > { %1577 = vrcp.f32 %v1251_v2 }
 0x1d2   : > { %v1576_v9 = vpop.eup %1575 }
 0x1d3   : > { %1256 = vst.msk [vmem:[%s190_s22] sm:$0xff] %vm196_vm0, %v1576_v9 }
 0x1d9   : > { %v1578_v16 = vpop.eup %1577 }
 0x1da   : > { %1257 = vst.msk [vmem:[%s190_s22 + $0x8] sm:$0xff] %vm196_vm0, %v1578_v16 }
 0x1db   : > { %1638 = shalt.err (!%p1635_p12)
}
 0x1dc   : > { %s1639_s28 = scalar_lea.hbm %s2632_s5, 256  ;;  %s1643_s8 = scalar_lea.hbm %s2686_s2, 512 }
 0x1dd   : > { %p1640_p4 = scmp.ne.s32.totalorder %s2632_s5, %s1639_s28  ;;  %p1644_p5 = scmp.lt.u32.totalorder %s2632_s5, %s2686_s2 }
 0x1de   : > { %p1645_p9 = scmp.lt.u32.totalorder %s1643_s8, %s1639_s28  ;;  %p1647_p8 = scmp.lt.u32.totalorder %s1639_s28, %s2632_s5 }
 0x1df   : > { %p1641_p10 = pnand %p1640_p4, %p2778_p13 }
 0x1e0   : > { %p1646_p3 = por %p1645_p9, %p1644_p5 }
 0x1e1   : > { %p1642_p11 = pneg %p1641_p10 }
 0x1e2   : > { %p1648_p0 = por %p1647_p8, %p1646_p3 }
 0x1e4   : > { %p1649_p2 = pnand %p1648_p0, %p1642_p11 }
 0x1e6   : > { %1652 = shalt.err (!%p1649_p2)
}
 0x1e7   : > { %s1726_s18 = smov 128   ;;  %s1727_s19 = smov 8  }
 0x1e8   : > { %1492 = dma.vmem_to_hbm [thread:$0]  (%p2778_p13), %s2634_s24, 256, %s2632_s5, %s1259_s16, %s1726_s18, %s1726_s18, %s1727_s19  }
 0x1e9 PF: > { %s1287_s22 = sand.u32 1, %s1691_s9   ;;  %p2779_p6 = scmp.ne.s32.totalorder %s2703_s21, 0 }
 0x1ea   : > { %p2780_p1 = scmp.ge.s32.totalorder %s1711_s14, 2  ;;  %s1288_s29 = scalar_lea.sflag [#allocation10], %s1287_s22 }
 0x1ec   : > { %p1503_p7 = pnand %p2780_p1, %p2779_p6 }
 0x1ee   : > { %1686 = dma.done.wait (!%p1503_p7), %s1288_s29, 256  }
 0x1ef   : > { %1688 = vsyncadd (!%p1503_p7), %s1288_s29, 4294967040  ;;  %s19_s14 = sadd.s32 1, %s1711_s14   ;;  %s2781_s9 = smov %s1695_s10 }
 0x1f0   : > { %p16_p12 = scmp.ge.s32.totalorder %s19_s14, 4   ;;  %s2782_s10 = smov %s1699_s11 }
 0x1f1   : > { %s2783_s11 = smov %s1844_s4  ;;  %s2784_s12 = smov %s1707_s13 }
 0x1f2   : > { %s2785_s13 = smov %s2787_s25  ;;  %18 = sbr.rel (!%p16_p12) target bundleno = 7 (0x7), region = 86 }
 0x1f9   :  { %1293 = vsyncpa [#allocation9], 1 }
 0x1fa   :  { %1295 = vsyncpa [#allocation9 + $0x1], 1 }
 0x1fb   :  { %1296 = vsyncpa [#allocation10], 1 }
 0x1fc   :  { %1298 = vsyncpa [#allocation10 + $0x1], 1 }
 0x1fd   :  { %1299 = vsyncpa [#allocation11], 1 }
 0x1fe   :  { %1301 = vsyncpa [#allocation11 + $0x1], 1 }

</bundles_post_ra>
